<compile_context>
chip_gen: v6e
topology: v6e:2x2x1
jax: 0.10.0
libtpu: 0.0.40
codegen_flags: <defaults>
</compile_context>

<pallas_src>
import functools

import jax
import jax.numpy as jnp
from jax.experimental import pallas as pl
from jax.experimental.pallas import tpu as pltpu

SMEM = pltpu.MemorySpace.SMEM

_NEG_BIG = -1e30


# ---------------------------------------------------------------------------
# Hardware-aware helpers
# ---------------------------------------------------------------------------
def _round_up(a, m):
    return ((a + m - 1) // m) * m


def _vmem_limit_bytes():
    """Generation-aware scoped-VMEM limit (v7x has 64 MiB, v5e/v6e 128 MiB)."""
    try:
        cap = pltpu.get_tpu_info().vmem_capacity_bytes
    except Exception:
        cap = 64 << 20
    return int(max(32 << 20, min(cap - (16 << 20), 100 << 20)))


def _compiler_params():
    return pltpu.CompilerParams(
        dimension_semantics=("parallel",),
        vmem_limit_bytes=_vmem_limit_bytes(),
    )


def _pick_tile(num_nodes):
    """Largest destination-row tile whose [tile, N_pad] working set fits the
    generation-specific VMEM budget (double-buffered bf16 eattr + ~4 f32 temps)."""
    n_est = _round_up(max(int(num_nodes), 1), 128)
    budget = 0.5 * _vmem_limit_bytes()
    per_row = n_est * (2 * 2 + 4 * 4)   # eattr bf16 x2 buffers + 4 f32 temporaries
    for t in (256, 128, 64, 32):
        if t * per_row <= budget:
            return min(t, n_est)
    return 32


@functools.lru_cache(maxsize=None)
def _single_buffer_ok():
    """Probe whether pipeline_mode=pl.Buffered(1) is supported; fall back silently."""
    try:
        def _copy(x_ref, o_ref):
            o_ref[...] = x_ref[...]

        x = jnp.arange(8 * 128, dtype=jnp.float32).reshape(8, 128)
        out = pl.pallas_call(
            _copy,
            out_shape=jax.ShapeDtypeStruct((16, 128), jnp.float32),
            grid=(2,),
            in_specs=[pl.BlockSpec((8, 128), lambda i: (0, 0),
                                   pipeline_mode=pl.Buffered(1))],
            out_specs=pl.BlockSpec((8, 128), lambda i: (i, 0)),
        )(x)
        out = jax.block_until_ready(out)
        return bool(jnp.all(out[:8] == x)) and bool(jnp.all(out[8:] == x))
    except Exception:
        return False


def _inv_spec(shape):
    """BlockSpec for a grid-invariant (never re-fetched) input; single-buffered."""
    index_map = lambda i: (0,) * len(shape)
    if _single_buffer_ok():
        return pl.BlockSpec(shape, index_map, pipeline_mode=pl.Buffered(1))
    return pl.BlockSpec(shape, index_map)


# ---------------------------------------------------------------------------
# Pallas kernels (one destination-row tile per grid step)
# ---------------------------------------------------------------------------
def gat_layer_kernel(xw_ref, asrc_ref, adst_ref, ecoef_ref, eattr_ref, bias_ref,
                     out_ref, *, heads, apply_elu):
    """One dense GATConv layer (concat=True) for one destination-row tile.

    xw_ref   : [heads, N_pad, C]  bf16  source projections      (grid-invariant)
    asrc_ref : [heads, N_pad]     f32   per-source attn term     (grid-invariant)
    adst_ref : [tile, heads]      f32   per-destination attn term (this tile)
    ecoef_ref: [heads]            f32   SMEM edge-attr coefficient per head
    eattr_ref: [tile, N_pad]      bf16  dense edge attrs, NaN == "no edge"
    bias_ref : [heads, 1, C]      f32                            (grid-invariant)
    out_ref  : [heads, tile, C]   f32   head-major output
    """
    e = eattr_ref[...].astype(jnp.float32)
    mask = jnp.logical_not(jnp.isnan(e))
    e = jnp.where(mask, e, 0.0)

    a_src = asrc_ref[...]                               # [heads, N_pad]
    a_dst = adst_ref[...]                               # [tile, heads]

    for h in range(heads):
        logits = a_dst[:, h:h + 1] + a_src[h:h + 1, :] + e * ecoef_ref[h]
        logits = jnp.maximum(logits, 0.2 * logits)      # LeakyReLU(0.2)
        logits = jnp.where(mask, logits, _NEG_BIG)
        m = jnp.max(logits, axis=-1, keepdims=True)
        p = jnp.exp(logits - m)                         # masked -> exp(-1e30) == 0
        denom = jnp.sum(p, axis=-1, keepdims=True)      # > 0 (mean self-loops)
        alpha = (p * pl.reciprocal(denom, approx=True)).astype(jnp.bfloat16)
        agg = jnp.dot(alpha, xw_ref[h],
                      preferred_element_type=jnp.float32)      # bf16 MXU, f32 acc
        agg = agg + bias_ref[h]
        if apply_elu:
            agg = jnp.where(agg > 0, agg, jnp.exp(agg) - 1.0)  # ELU
        out_ref[h] = agg


def gat_fc_layer_kernel(xw_ref, asrc_ref, adst_ref, ecoef_ref, eattr_ref,
                        bias_ref, fcw_ref, fcb_ref, out_ref):
    """conv2 (heads=1, no activation) with the Linear(out_features, 1) head fused."""
    e = eattr_ref[...].astype(jnp.float32)
    mask = jnp.logical_not(jnp.isnan(e))
    e = jnp.where(mask, e, 0.0)

    logits = adst_ref[...] + asrc_ref[...] + e * ecoef_ref[0]
    logits = jnp.maximum(logits, 0.2 * logits)
    logits = jnp.where(mask, logits, _NEG_BIG)
    m = jnp.max(logits, axis=-1, keepdims=True)
    p = jnp.exp(logits - m)
    denom = jnp.sum(p, axis=-1, keepdims=True)
    alpha = (p * pl.reciprocal(denom, approx=True)).astype(jnp.bfloat16)

    h2 = jnp.dot(alpha, xw_ref[...], preferred_element_type=jnp.float32)
    h2 = h2 + bias_ref[...]                                     # [tile, C2]
    # Fused fc: VPU multiply + lane reduce.  (Width-1 output block: tiny volume.)
    out_ref[...] = jnp.sum(h2 * fcw_ref[...], axis=-1, keepdims=True) + fcb_ref[0]


# ---------------------------------------------------------------------------
# pallas_call wrappers
# ---------------------------------------------------------------------------
def gat_layer(xw_hm, a_src, a_dst, ecoef, eattr, bias_hm, *,
              heads, chans, apply_elu, tile):
    n_pad = eattr.shape[0]
    kernel = functools.partial(gat_layer_kernel, heads=heads, apply_elu=apply_elu)
    return pl.pallas_call(
        kernel,
        out_shape=jax.ShapeDtypeStruct((heads, n_pad, chans), jnp.float32),
        grid=(n_pad // tile,),
        in_specs=[
            _inv_spec((heads, n_pad, chans)),                 # xw (bf16, invariant)
            _inv_spec((heads, n_pad)),                        # a_src (invariant)
            pl.BlockSpec((tile, heads), lambda i: (i, 0)),    # a_dst (dst tile)
            pl.BlockSpec(memory_space=SMEM),                  # ecoef [heads]
            pl.BlockSpec((tile, n_pad), lambda i: (i, 0)),    # dense edge attrs (bf16)
            _inv_spec((heads, 1, chans)),                     # bias (invariant)
        ],
        out_specs=pl.BlockSpec((heads, tile, chans), lambda i: (0, i, 0)),
        compiler_params=_compiler_params(),
    )(xw_hm, a_src, a_dst, ecoef, eattr, bias_hm)


def gat_fc_layer(xw2, a_src, a_dst, ecoef, eattr, bias, fc_w, fc_b, *, chans, tile):
    n_pad = eattr.shape[0]
    return pl.pallas_call(
        gat_fc_layer_kernel,
        out_shape=jax.ShapeDtypeStruct((n_pad, 1), jnp.float32),
        grid=(n_pad // tile,),
        in_specs=[
            _inv_spec((n_pad, chans)),                        # xw2 (bf16, invariant)
            _inv_spec((1, n_pad)),                            # a_src2 (invariant)
            pl.BlockSpec((tile, 1), lambda i: (i, 0)),        # a_dst2 (dst tile)
            pl.BlockSpec(memory_space=SMEM),                  # ecoef2 [1]
            pl.BlockSpec((tile, n_pad), lambda i: (i, 0)),    # dense edge attrs (bf16)
            _inv_spec((1, chans)),                            # bias2 (invariant)
            _inv_spec((1, chans)),                            # fc weight row (invariant)
            pl.BlockSpec(memory_space=SMEM),                  # fc bias [1]
        ],
        out_specs=pl.BlockSpec((tile, 1), lambda i: (i, 0)),
        compiler_params=_compiler_params(),
    )(xw2, a_src, a_dst, ecoef, eattr, bias, fc_w, fc_b)


# ---------------------------------------------------------------------------
# Graph preparation (cacheable) and parameter setup
# ---------------------------------------------------------------------------
def build_dense_edge_attr(edge_index, edge_attr, num_nodes_padded):
    """Dense [N_pad, N_pad] edge-attr matrix in bf16; NaN == "no edge".
    Self-loops: remove existing, re-add with per-destination mean (PyG
    fill_value='mean'); padded rows get a 0-attr self-loop so every softmax row
    has at least one valid entry."""
    src, dst = edge_index[0], edge_index[1]
    nonself = (src != dst).astype(jnp.float32)

    eattr = jnp.full((num_nodes_padded, num_nodes_padded), jnp.nan, jnp.float32)
    eattr = eattr.at[dst, src].set(edge_attr)

    deg = jax.ops.segment_sum(nonself, dst, num_segments=num_nodes_padded)
    attr_sum = jax.ops.segment_sum(edge_attr * nonself, dst,
                                   num_segments=num_nodes_padded)
    self_attr = jnp.where(deg > 0, attr_sum / jnp.maximum(deg, 1.0), 0.0)

    diag = jnp.arange(num_nodes_padded)
    eattr = eattr.at[diag, diag].set(self_attr)   # overwrites any existing self-loop
    return eattr.astype(jnp.bfloat16)             # halve the only O(N^2) HBM stream


def prepare_graph(x, edge_index, edge_attr, tile):
    """Pad node features and densify the graph ONCE; reuse across forward calls."""
    num_nodes = x.shape[0]
    n_pad = _round_up(num_nodes, max(tile, 128))
    x_pad = jnp.zeros((n_pad, x.shape[1]), jnp.float32).at[:num_nodes].set(x)
    eattr = build_dense_edge_attr(edge_index, edge_attr, n_pad)
    return x_pad, eattr


def init_params(key, in_features, hidden, out_features, heads):
    ks = jax.random.split(key, 14)
    s = 0.2
    n = jax.random.normal
    return {
        # conv1: GATConv(in_features, hidden, heads=heads, edge_dim=1)
        "w1":        n(ks[0], (in_features, heads * hidden), jnp.float32) * s,
        "att_src1":  n(ks[1], (heads, hidden), jnp.float32) * s,
        "att_dst1":  n(ks[2], (heads, hidden), jnp.float32) * s,
        "att_edge1": n(ks[3], (heads, hidden), jnp.float32) * s,
        "lin_edge1": n(ks[4], (heads * hidden,), jnp.float32) * s,
        "bias1":     n(ks[5], (heads * hidden,), jnp.float32) * s,
        # conv2: GATConv(hidden*heads, out_features, heads=1, edge_dim=1)
        "w2":        n(ks[6], (heads * hidden, out_features), jnp.float32) * s,
        "att_src2":  n(ks[7], (1, out_features), jnp.float32) * s,
        "att_dst2":  n(ks[8], (1, out_features), jnp.float32) * s,
        "att_edge2": n(ks[9], (1, out_features), jnp.float32) * s,
        "lin_edge2": n(ks[10], (out_features,), jnp.float32) * s,
        "bias2":     n(ks[11], (out_features,), jnp.float32) * s,
        # fc: Linear(out_features, 1)
        "fc_w":      n(ks[12], (out_features, 1), jnp.float32) * s,
        "fc_b":      n(ks[13], (1,), jnp.float32) * s,
    }


# ---------------------------------------------------------------------------
# Forward pass (dropout is identity in eval mode)
# ---------------------------------------------------------------------------
@functools.partial(jax.jit,
                   static_argnames=("heads", "hidden", "out_features", "tile"))
def gat_evolution_forward(params, x_pad, eattr, *, heads, hidden, out_features, tile):
    n_pad = x_pad.shape[0]

    # ---- conv1 (+ ELU): hoist all grid-invariant projections into XLA --------
    xw1 = (x_pad @ params["w1"]).reshape(n_pad, heads, hidden).transpose(1, 0, 2)
    a_src1 = jnp.einsum("hnc,hc->hn", xw1, params["att_src1"])          # [H, N]
    a_dst1 = jnp.einsum("hnc,hc->nh", xw1, params["att_dst1"])          # [N, H]
    ecoef1 = jnp.sum(params["lin_edge1"].reshape(heads, hidden)
                     * params["att_edge1"], axis=-1)                    # [H]
    bias1 = params["bias1"].reshape(heads, 1, hidden)                   # [H, 1, C1]

    h1 = gat_layer(xw1.astype(jnp.bfloat16), a_src1, a_dst1, ecoef1, eattr, bias1,
                   heads=heads, chans=hidden, apply_elu=True, tile=tile)
    h1 = h1.transpose(1, 0, 2).reshape(n_pad, heads * hidden)           # [N, H*C1]

    # ---- conv2 (heads=1) + fused fc ------------------------------------------
    xw2 = h1 @ params["w2"]                                             # [N, C2]
    a_src2 = (xw2 * params["att_src2"].reshape(1, -1)).sum(-1).reshape(1, n_pad)
    a_dst2 = (xw2 * params["att_dst2"].reshape(1, -1)).sum(-1, keepdims=True)
    ecoef2 = jnp.sum(params["lin_edge2"]
                     * params["att_edge2"].reshape(-1)).reshape(1)      # [1]

    y = gat_fc_layer(xw2.astype(jnp.bfloat16), a_src2, a_dst2, ecoef2, eattr,
                     params["bias2"].reshape(1, -1),
                     params["fc_w"].reshape(1, -1), params["fc_b"],
                     chans=out_features, tile=tile)                     # [N_pad, 1]
    return y


if __name__ == "__main__":
    N, IN_F, HID, HEADS, OUT_F = 8, 4, 8, 2, 8

    key = jax.random.PRNGKey(0)
    kx, ke, kp = jax.random.split(key, 3)

    x = jax.random.normal(kx, (N, IN_F), jnp.float32)
    src = jnp.array([0, 1, 2, 3, 4, 5, 6, 7, 0, 2, 4, 6], jnp.int32)
    dst = jnp.array([1, 2, 3, 4, 5, 6, 7, 0, 4, 6, 0, 2], jnp.int32)
    edge_index = jnp.stack([src, dst])                      # [2, E]
    edge_attr = jax.random.uniform(ke, (edge_index.shape[1],), jnp.float32)

    params = init_params(kp, IN_F, HID, OUT_F, HEADS)

    tile = _pick_tile(N)
    # Graph is static -> densify once and reuse across forward calls.
    x_pad, eattr = prepare_graph(x, edge_index, edge_attr, tile)

    y_pad = gat_evolution_forward(params, x_pad, eattr,
                                  heads=HEADS, hidden=HID, out_features=OUT_F,
                                  tile=tile)
    y_pad = jax.block_until_ready(y_pad)
    y = y_pad[:N]
    assert y.shape == (N, 1), y.shape
    assert bool(jnp.all(jnp.isfinite(y)))
    print("KERNEL_OK")
</pallas_src>

<mosaic_0001>
module attributes {stable_mosaic.version = 11 : i64} {
  func.func @gat_layer_kernel(%arg0: i32, %arg1: memref<2x128x8xbf16, #tpu.memory_space<vmem>>, %arg2: memref<2x128xf32, #tpu.memory_space<vmem>>, %arg3: memref<128x2xf32, #tpu.memory_space<vmem>>, %arg4: memref<2xf32, #tpu.memory_space<smem>>, %arg5: memref<128x128xbf16, #tpu.memory_space<vmem>>, %arg6: memref<2x1x8xf32, #tpu.memory_space<vmem>>, %arg7: memref<2x128x8xf32, #tpu.memory_space<vmem>>) attributes {dimension_semantics = [#tpu.dimension_semantics<parallel>], iteration_bounds = array<i64: 1>, scalar_prefetch = 0 : i64, scratch_operands = 0 : i64, tpu.core_type = #tpu.core_type<tc>, window_params = [{pipeline_mode = #tpu.pipeline_mode<synchronous>, transform_indices = @transform_0, window_bounds = array<i64: 2, 128, 8>}, {pipeline_mode = #tpu.pipeline_mode<synchronous>, transform_indices = @transform_1, window_bounds = array<i64: 2, 128>}, {transform_indices = @transform_2, window_bounds = array<i64: 128, 2>}, {transform_indices = @transform_3, window_bounds = array<i64: 2>}, {transform_indices = @transform_4, window_bounds = array<i64: 128, 128>}, {pipeline_mode = #tpu.pipeline_mode<synchronous>, transform_indices = @transform_5, window_bounds = array<i64: 2, 1, 8>}, {transform_indices = @transform_6, window_bounds = array<i64: 2, 128, 8>}]} {
    %c0 = arith.constant 0 : index
    %c0_0 = arith.constant 0 : index
    %0 = vector.load %arg5[%c0, %c0_0] : memref<128x128xbf16, #tpu.memory_space<vmem>>, vector<128x128xbf16>
    %1 = arith.extf %0 : vector<128x128xbf16> to vector<128x128xf32>
    %2 = arith.cmpf one, %1, %1 : vector<128x128xf32>
    %cst = arith.constant dense<true> : vector<128x128xi1>
    %3 = arith.xori %2, %cst : vector<128x128xi1>
    %cst_1 = arith.constant 0.000000e+00 : f32
    %4 = vector.broadcast %cst_1 : f32 to vector<128x128xf32>
    %5 = arith.select %3, %1, %4 : vector<128x128xi1>, vector<128x128xf32>
    %c0_2 = arith.constant 0 : index
    %c0_3 = arith.constant 0 : index
    %6 = vector.load %arg2[%c0_2, %c0_3] : memref<2x128xf32, #tpu.memory_space<vmem>>, vector<2x128xf32>
    %c0_4 = arith.constant 0 : index
    %c0_5 = arith.constant 0 : index
    %7 = vector.load %arg3[%c0_4, %c0_5] : memref<128x2xf32, #tpu.memory_space<vmem>>, vector<128x2xf32>
    %8 = vector.extract_strided_slice %7 {offsets = [0, 0], sizes = [128, 1], strides = [1, 1]} : vector<128x2xf32> to vector<128x1xf32>
    %9 = vector.extract_strided_slice %6 {offsets = [0, 0], sizes = [1, 128], strides = [1, 1]} : vector<2x128xf32> to vector<1x128xf32>
    %10 = vector.broadcast %8 : vector<128x1xf32> to vector<128x128xf32>
    %11 = vector.broadcast %9 : vector<1x128xf32> to vector<128x128xf32>
    %12 = arith.addf %10, %11 : vector<128x128xf32>
    %c0_6 = arith.constant 0 : index
    %13 = memref.load %arg4[%c0_6] : memref<2xf32, #tpu.memory_space<smem>>
    %14 = vector.broadcast %13 : f32 to vector<128x128xf32>
    %15 = arith.mulf %5, %14 : vector<128x128xf32>
    %16 = arith.addf %12, %15 : vector<128x128xf32>
    %cst_7 = arith.constant 2.000000e-01 : f32
    %17 = vector.broadcast %cst_7 : f32 to vector<128x128xf32>
    %18 = arith.mulf %17, %16 : vector<128x128xf32>
    %19 = arith.maximumf %16, %18 : vector<128x128xf32>
    %cst_8 = arith.constant -1.000000e+30 : f32
    %20 = vector.broadcast %cst_8 : f32 to vector<128x128xf32>
    %21 = arith.select %3, %19, %20 : vector<128x128xi1>, vector<128x128xf32>
    %cst_9 = arith.constant dense<0xFF800000> : vector<128xf32>
    %22 = vector.multi_reduction <maximumf>, %21, %cst_9 [1] : vector<128x128xf32> to vector<128xf32>
    %23 = vector.shape_cast %22 : vector<128xf32> to vector<128x1xf32>
    %24 = vector.broadcast %23 : vector<128x1xf32> to vector<128x128xf32>
    %25 = arith.subf %21, %24 : vector<128x128xf32>
    %26 = math.exp %25 : vector<128x128xf32>
    %cst_10 = arith.constant dense<0.000000e+00> : vector<128xf32>
    %27 = vector.multi_reduction <add>, %26, %cst_10 [1] : vector<128x128xf32> to vector<128xf32>
    %28 = vector.shape_cast %27 : vector<128xf32> to vector<128x1xf32>
    %29 = tpu.reciprocal %28 {approx = true} : vector<128x1xf32> -> vector<128x1xf32>
    %30 = vector.broadcast %29 : vector<128x1xf32> to vector<128x128xf32>
    %31 = arith.mulf %26, %30 : vector<128x128xf32>
    %32 = arith.truncf %31 : vector<128x128xf32> to vector<128x128xbf16>
    %c0_11 = arith.constant 0 : index
    %c0_12 = arith.constant 0 : index
    %c0_13 = arith.constant 0 : index
    %33 = vector.load %arg1[%c0_11, %c0_12, %c0_13] : memref<2x128x8xbf16, #tpu.memory_space<vmem>>, vector<1x128x8xbf16>
    %34 = vector.shape_cast %33 : vector<1x128x8xbf16> to vector<128x8xbf16>
    %cst_14 = arith.constant dense<0.000000e+00> : vector<128x8xf32>
    %35 = tpu.matmul %32, %34, %cst_14 {dimension_numbers = #tpu.dot_dimension_numbers<[1], [0], [0], [1], [0, 0, 1, 1], [], []>} : vector<128x128xbf16>, vector<128x8xbf16>, vector<128x8xf32> -> vector<128x8xf32>
    %c0_15 = arith.constant 0 : index
    %c0_16 = arith.constant 0 : index
    %c0_17 = arith.constant 0 : index
    %36 = vector.load %arg6[%c0_15, %c0_16, %c0_17] : memref<2x1x8xf32, #tpu.memory_space<vmem>>, vector<1x1x8xf32>
    %37 = vector.shape_cast %36 : vector<1x1x8xf32> to vector<1x8xf32>
    %38 = vector.broadcast %37 : vector<1x8xf32> to vector<128x8xf32>
    %39 = arith.addf %35, %38 : vector<128x8xf32>
    %cst_18 = arith.constant 0.000000e+00 : f32
    %40 = vector.broadcast %cst_18 : f32 to vector<128x8xf32>
    %41 = arith.cmpf ogt, %39, %40 : vector<128x8xf32>
    %42 = math.exp %39 : vector<128x8xf32>
    %cst_19 = arith.constant 1.000000e+00 : f32
    %43 = vector.broadcast %cst_19 : f32 to vector<128x8xf32>
    %44 = arith.subf %42, %43 : vector<128x8xf32>
    %45 = arith.select %41, %39, %44 : vector<128x8xi1>, vector<128x8xf32>
    %c0_20 = arith.constant 0 : index
    %c0_21 = arith.constant 0 : index
    %c0_22 = arith.constant 0 : index
    %46 = vector.load %arg7[%c0_20, %c0_21, %c0_22] : memref<2x128x8xf32, #tpu.memory_space<vmem>>, vector<1x128x8xf32>
    %47 = vector.shape_cast %46 : vector<1x128x8xf32> to vector<128x8xf32>
    %48 = vector.shape_cast %45 : vector<128x8xf32> to vector<1x128x8xf32>
    tpu.vector_store %arg7[%c0_20, %c0_21, %c0_22], %48 {strides = array<i32>} : memref<2x128x8xf32, #tpu.memory_space<vmem>>, vector<1x128x8xf32>,
    %49 = vector.extract_strided_slice %7 {offsets = [0, 1], sizes = [128, 1], strides = [1, 1]} : vector<128x2xf32> to vector<128x1xf32>
    %50 = vector.extract_strided_slice %6 {offsets = [1, 0], sizes = [1, 128], strides = [1, 1]} : vector<2x128xf32> to vector<1x128xf32>
    %51 = vector.broadcast %49 : vector<128x1xf32> to vector<128x128xf32>
    %52 = vector.broadcast %50 : vector<1x128xf32> to vector<128x128xf32>
    %53 = arith.addf %51, %52 : vector<128x128xf32>
    %c1 = arith.constant 1 : index
    %54 = memref.load %arg4[%c1] : memref<2xf32, #tpu.memory_space<smem>>
    %55 = vector.broadcast %54 : f32 to vector<128x128xf32>
    %56 = arith.mulf %5, %55 : vector<128x128xf32>
    %57 = arith.addf %53, %56 : vector<128x128xf32>
    %cst_23 = arith.constant 2.000000e-01 : f32
    %58 = vector.broadcast %cst_23 : f32 to vector<128x128xf32>
    %59 = arith.mulf %58, %57 : vector<128x128xf32>
    %60 = arith.maximumf %57, %59 : vector<128x128xf32>
    %cst_24 = arith.constant -1.000000e+30 : f32
    %61 = vector.broadcast %cst_24 : f32 to vector<128x128xf32>
    %62 = arith.select %3, %60, %61 : vector<128x128xi1>, vector<128x128xf32>
    %cst_25 = arith.constant dense<0xFF800000> : vector<128xf32>
    %63 = vector.multi_reduction <maximumf>, %62, %cst_25 [1] : vector<128x128xf32> to vector<128xf32>
    %64 = vector.shape_cast %63 : vector<128xf32> to vector<128x1xf32>
    %65 = vector.broadcast %64 : vector<128x1xf32> to vector<128x128xf32>
    %66 = arith.subf %62, %65 : vector<128x128xf32>
    %67 = math.exp %66 : vector<128x128xf32>
    %cst_26 = arith.constant dense<0.000000e+00> : vector<128xf32>
    %68 = vector.multi_reduction <add>, %67, %cst_26 [1] : vector<128x128xf32> to vector<128xf32>
    %69 = vector.shape_cast %68 : vector<128xf32> to vector<128x1xf32>
    %70 = tpu.reciprocal %69 {approx = true} : vector<128x1xf32> -> vector<128x1xf32>
    %71 = vector.broadcast %70 : vector<128x1xf32> to vector<128x128xf32>
    %72 = arith.mulf %67, %71 : vector<128x128xf32>
    %73 = arith.truncf %72 : vector<128x128xf32> to vector<128x128xbf16>
    %c1_27 = arith.constant 1 : index
    %c0_28 = arith.constant 0 : index
    %c0_29 = arith.constant 0 : index
    %74 = vector.load %arg1[%c1_27, %c0_28, %c0_29] : memref<2x128x8xbf16, #tpu.memory_space<vmem>>, vector<1x128x8xbf16>
    %75 = vector.shape_cast %74 : vector<1x128x8xbf16> to vector<128x8xbf16>
    %cst_30 = arith.constant dense<0.000000e+00> : vector<128x8xf32>
    %76 = tpu.matmul %73, %75, %cst_30 {dimension_numbers = #tpu.dot_dimension_numbers<[1], [0], [0], [1], [0, 0, 1, 1], [], []>} : vector<128x128xbf16>, vector<128x8xbf16>, vector<128x8xf32> -> vector<128x8xf32>
    %c1_31 = arith.constant 1 : index
    %c0_32 = arith.constant 0 : index
    %c0_33 = arith.constant 0 : index
    %77 = vector.load %arg6[%c1_31, %c0_32, %c0_33] : memref<2x1x8xf32, #tpu.memory_space<vmem>>, vector<1x1x8xf32>
    %78 = vector.shape_cast %77 : vector<1x1x8xf32> to vector<1x8xf32>
    %79 = vector.broadcast %78 : vector<1x8xf32> to vector<128x8xf32>
    %80 = arith.addf %76, %79 : vector<128x8xf32>
    %cst_34 = arith.constant 0.000000e+00 : f32
    %81 = vector.broadcast %cst_34 : f32 to vector<128x8xf32>
    %82 = arith.cmpf ogt, %80, %81 : vector<128x8xf32>
    %83 = math.exp %80 : vector<128x8xf32>
    %cst_35 = arith.constant 1.000000e+00 : f32
    %84 = vector.broadcast %cst_35 : f32 to vector<128x8xf32>
    %85 = arith.subf %83, %84 : vector<128x8xf32>
    %86 = arith.select %82, %80, %85 : vector<128x8xi1>, vector<128x8xf32>
    %c1_36 = arith.constant 1 : index
    %c0_37 = arith.constant 0 : index
    %c0_38 = arith.constant 0 : index
    %87 = vector.load %arg7[%c1_36, %c0_37, %c0_38] : memref<2x128x8xf32, #tpu.memory_space<vmem>>, vector<1x128x8xf32>
    %88 = vector.shape_cast %87 : vector<1x128x8xf32> to vector<128x8xf32>
    %89 = vector.shape_cast %86 : vector<128x8xf32> to vector<1x128x8xf32>
    tpu.vector_store %arg7[%c1_36, %c0_37, %c0_38], %89 {strides = array<i32>} : memref<2x128x8xf32, #tpu.memory_space<vmem>>, vector<1x128x8xf32>,
    return
  }
  func.func @transform_0(%arg0: i32) -> (i32, i32, i32) {
    %c0_i32 = arith.constant 0 : i32
    %c0_i32_0 = arith.constant 0 : i32
    %c0_i32_1 = arith.constant 0 : i32
    %c0_i32_2 = arith.constant 0 : i32
    return %c0_i32, %c0_i32_0, %c0_i32_1 : i32, i32, i32
  }
  func.func @transform_1(%arg0: i32) -> (i32, i32) {
    %c0_i32 = arith.constant 0 : i32
    %c0_i32_0 = arith.constant 0 : i32
    %c0_i32_1 = arith.constant 0 : i32
    return %c0_i32, %c0_i32_0 : i32, i32
  }
  func.func @transform_2(%arg0: i32) -> (i32, i32) {
    %c0_i32 = arith.constant 0 : i32
    %c0_i32_0 = arith.constant 0 : i32
    return %arg0, %c0_i32 : i32, i32
  }
  func.func @transform_3(%arg0: i32) -> i32 {
    %c0_i32 = arith.constant 0 : i32
    %c0_i32_0 = arith.constant 0 : i32
    return %c0_i32 : i32
  }
  func.func @transform_4(%arg0: i32) -> (i32, i32) {
    %c0_i32 = arith.constant 0 : i32
    %c0_i32_0 = arith.constant 0 : i32
    return %arg0, %c0_i32 : i32, i32
  }
  func.func @transform_5(%arg0: i32) -> (i32, i32, i32) {
    %c0_i32 = arith.constant 0 : i32
    %c0_i32_0 = arith.constant 0 : i32
    %c0_i32_1 = arith.constant 0 : i32
    %c0_i32_2 = arith.constant 0 : i32
    return %c0_i32, %c0_i32_0, %c0_i32_1 : i32, i32, i32
  }
  func.func @transform_6(%arg0: i32) -> (i32, i32, i32) {
    %c0_i32 = arith.constant 0 : i32
    %c0_i32_0 = arith.constant 0 : i32
    %c0_i32_1 = arith.constant 0 : i32
    return %c0_i32, %arg0, %c0_i32_0 : i32, i32, i32
  }
}

module attributes {stable_mosaic.version = 11 : i64} {
  func.func @gat_fc_layer_kernel(%arg0: i32, %arg1: memref<128x8xbf16, #tpu.memory_space<vmem>>, %arg2: memref<1x128xf32, #tpu.memory_space<vmem>>, %arg3: memref<128x1xf32, #tpu.memory_space<vmem>>, %arg4: memref<1xf32, #tpu.memory_space<smem>>, %arg5: memref<128x128xbf16, #tpu.memory_space<vmem>>, %arg6: memref<1x8xf32, #tpu.memory_space<vmem>>, %arg7: memref<1x8xf32, #tpu.memory_space<vmem>>, %arg8: memref<1xf32, #tpu.memory_space<smem>>, %arg9: memref<128x1xf32, #tpu.memory_space<vmem>>) attributes {dimension_semantics = [#tpu.dimension_semantics<parallel>], iteration_bounds = array<i64: 1>, scalar_prefetch = 0 : i64, scratch_operands = 0 : i64, tpu.core_type = #tpu.core_type<tc>, window_params = [{pipeline_mode = #tpu.pipeline_mode<synchronous>, transform_indices = @transform_0, window_bounds = array<i64: 128, 8>}, {pipeline_mode = #tpu.pipeline_mode<synchronous>, transform_indices = @transform_1, window_bounds = array<i64: 1, 128>}, {transform_indices = @transform_2, window_bounds = array<i64: 128, 1>}, {transform_indices = @transform_3, window_bounds = array<i64: 1>}, {transform_indices = @transform_4, window_bounds = array<i64: 128, 128>}, {pipeline_mode = #tpu.pipeline_mode<synchronous>, transform_indices = @transform_5, window_bounds = array<i64: 1, 8>}, {pipeline_mode = #tpu.pipeline_mode<synchronous>, transform_indices = @transform_6, window_bounds = array<i64: 1, 8>}, {transform_indices = @transform_7, window_bounds = array<i64: 1>}, {transform_indices = @transform_8, window_bounds = array<i64: 128, 1>}]} {
    %c0 = arith.constant 0 : index
    %c0_0 = arith.constant 0 : index
    %0 = vector.load %arg5[%c0, %c0_0] : memref<128x128xbf16, #tpu.memory_space<vmem>>, vector<128x128xbf16>
    %1 = arith.extf %0 : vector<128x128xbf16> to vector<128x128xf32>
    %2 = arith.cmpf one, %1, %1 : vector<128x128xf32>
    %cst = arith.constant dense<true> : vector<128x128xi1>
    %3 = arith.xori %2, %cst : vector<128x128xi1>
    %cst_1 = arith.constant 0.000000e+00 : f32
    %4 = vector.broadcast %cst_1 : f32 to vector<128x128xf32>
    %5 = arith.select %3, %1, %4 : vector<128x128xi1>, vector<128x128xf32>
    %c0_2 = arith.constant 0 : index
    %c0_3 = arith.constant 0 : index
    %6 = vector.load %arg3[%c0_2, %c0_3] : memref<128x1xf32, #tpu.memory_space<vmem>>, vector<128x1xf32>
    %c0_4 = arith.constant 0 : index
    %c0_5 = arith.constant 0 : index
    %7 = vector.load %arg2[%c0_4, %c0_5] : memref<1x128xf32, #tpu.memory_space<vmem>>, vector<1x128xf32>
    %8 = vector.broadcast %6 : vector<128x1xf32> to vector<128x128xf32>
    %9 = vector.broadcast %7 : vector<1x128xf32> to vector<128x128xf32>
    %10 = arith.addf %8, %9 : vector<128x128xf32>
    %c0_6 = arith.constant 0 : index
    %11 = memref.load %arg4[%c0_6] : memref<1xf32, #tpu.memory_space<smem>>
    %12 = vector.broadcast %11 : f32 to vector<128x128xf32>
    %13 = arith.mulf %5, %12 : vector<128x128xf32>
    %14 = arith.addf %10, %13 : vector<128x128xf32>
    %cst_7 = arith.constant 2.000000e-01 : f32
    %15 = vector.broadcast %cst_7 : f32 to vector<128x128xf32>
    %16 = arith.mulf %15, %14 : vector<128x128xf32>
    %17 = arith.maximumf %14, %16 : vector<128x128xf32>
    %cst_8 = arith.constant -1.000000e+30 : f32
    %18 = vector.broadcast %cst_8 : f32 to vector<128x128xf32>
    %19 = arith.select %3, %17, %18 : vector<128x128xi1>, vector<128x128xf32>
    %cst_9 = arith.constant dense<0xFF800000> : vector<128xf32>
    %20 = vector.multi_reduction <maximumf>, %19, %cst_9 [1] : vector<128x128xf32> to vector<128xf32>
    %21 = vector.shape_cast %20 : vector<128xf32> to vector<128x1xf32>
    %22 = vector.broadcast %21 : vector<128x1xf32> to vector<128x128xf32>
    %23 = arith.subf %19, %22 : vector<128x128xf32>
    %24 = math.exp %23 : vector<128x128xf32>
    %cst_10 = arith.constant dense<0.000000e+00> : vector<128xf32>
    %25 = vector.multi_reduction <add>, %24, %cst_10 [1] : vector<128x128xf32> to vector<128xf32>
    %26 = vector.shape_cast %25 : vector<128xf32> to vector<128x1xf32>
    %27 = tpu.reciprocal %26 {approx = true} : vector<128x1xf32> -> vector<128x1xf32>
    %28 = vector.broadcast %27 : vector<128x1xf32> to vector<128x128xf32>
    %29 = arith.mulf %24, %28 : vector<128x128xf32>
    %30 = arith.truncf %29 : vector<128x128xf32> to vector<128x128xbf16>
    %c0_11 = arith.constant 0 : index
    %c0_12 = arith.constant 0 : index
    %31 = vector.load %arg1[%c0_11, %c0_12] : memref<128x8xbf16, #tpu.memory_space<vmem>>, vector<128x8xbf16>
    %cst_13 = arith.constant dense<0.000000e+00> : vector<128x8xf32>
    %32 = tpu.matmul %30, %31, %cst_13 {dimension_numbers = #tpu.dot_dimension_numbers<[1], [0], [0], [1], [0, 0, 1, 1], [], []>} : vector<128x128xbf16>, vector<128x8xbf16>, vector<128x8xf32> -> vector<128x8xf32>
    %c0_14 = arith.constant 0 : index
    %c0_15 = arith.constant 0 : index
    %33 = vector.load %arg6[%c0_14, %c0_15] : memref<1x8xf32, #tpu.memory_space<vmem>>, vector<1x8xf32>
    %34 = vector.broadcast %33 : vector<1x8xf32> to vector<128x8xf32>
    %35 = arith.addf %32, %34 : vector<128x8xf32>
    %c0_16 = arith.constant 0 : index
    %c0_17 = arith.constant 0 : index
    %36 = vector.load %arg7[%c0_16, %c0_17] : memref<1x8xf32, #tpu.memory_space<vmem>>, vector<1x8xf32>
    %37 = vector.broadcast %36 : vector<1x8xf32> to vector<128x8xf32>
    %38 = arith.mulf %35, %37 : vector<128x8xf32>
    %cst_18 = arith.constant dense<0.000000e+00> : vector<128xf32>
    %39 = vector.multi_reduction <add>, %38, %cst_18 [1] : vector<128x8xf32> to vector<128xf32>
    %40 = vector.shape_cast %39 : vector<128xf32> to vector<128x1xf32>
    %c0_19 = arith.constant 0 : index
    %41 = memref.load %arg8[%c0_19] : memref<1xf32, #tpu.memory_space<smem>>
    %42 = vector.broadcast %41 : f32 to vector<128x1xf32>
    %43 = arith.addf %40, %42 : vector<128x1xf32>
    %c0_20 = arith.constant 0 : index
    %c0_21 = arith.constant 0 : index
    %44 = vector.load %arg9[%c0_20, %c0_21] : memref<128x1xf32, #tpu.memory_space<vmem>>, vector<128x1xf32>
    tpu.vector_store %arg9[%c0_20, %c0_21], %43 {strides = array<i32>} : memref<128x1xf32, #tpu.memory_space<vmem>>, vector<128x1xf32>,
    return
  }
  func.func @transform_0(%arg0: i32) -> (i32, i32) {
    %c0_i32 = arith.constant 0 : i32
    %c0_i32_0 = arith.constant 0 : i32
    %c0_i32_1 = arith.constant 0 : i32
    return %c0_i32, %c0_i32_0 : i32, i32
  }
  func.func @transform_1(%arg0: i32) -> (i32, i32) {
    %c0_i32 = arith.constant 0 : i32
    %c0_i32_0 = arith.constant 0 : i32
    %c0_i32_1 = arith.constant 0 : i32
    return %c0_i32, %c0_i32_0 : i32, i32
  }
  func.func @transform_2(%arg0: i32) -> (i32, i32) {
    %c0_i32 = arith.constant 0 : i32
    %c0_i32_0 = arith.constant 0 : i32
    return %arg0, %c0_i32 : i32, i32
  }
  func.func @transform_3(%arg0: i32) -> i32 {
    %c0_i32 = arith.constant 0 : i32
    %c0_i32_0 = arith.constant 0 : i32
    return %c0_i32 : i32
  }
  func.func @transform_4(%arg0: i32) -> (i32, i32) {
    %c0_i32 = arith.constant 0 : i32
    %c0_i32_0 = arith.constant 0 : i32
    return %arg0, %c0_i32 : i32, i32
  }
  func.func @transform_5(%arg0: i32) -> (i32, i32) {
    %c0_i32 = arith.constant 0 : i32
    %c0_i32_0 = arith.constant 0 : i32
    %c0_i32_1 = arith.constant 0 : i32
    return %c0_i32, %c0_i32_0 : i32, i32
  }
  func.func @transform_6(%arg0: i32) -> (i32, i32) {
    %c0_i32 = arith.constant 0 : i32
    %c0_i32_0 = arith.constant 0 : i32
    %c0_i32_1 = arith.constant 0 : i32
    return %c0_i32, %c0_i32_0 : i32, i32
  }
  func.func @transform_7(%arg0: i32) -> i32 {
    %c0_i32 = arith.constant 0 : i32
    %c0_i32_0 = arith.constant 0 : i32
    return %c0_i32 : i32
  }
  func.func @transform_8(%arg0: i32) -> (i32, i32) {
    %c0_i32 = arith.constant 0 : i32
    %c0_i32_0 = arith.constant 0 : i32
    return %arg0, %c0_i32 : i32, i32
  }
}

</mosaic_0001>

<bundles_post_ra>
// kernel: gat_evolution_forward.3
= control target key start
LH: loop header
LB: loop body
LE: loop exit
PB: predicated region body
PF: predicated region fallthrough
CT: control target
= control target key end

     0   :  { %v934_v0 = vmov 0   ;;  %vm935_vm2 = vmmov 1   ;;  %s1577_s2 = inlined_call_operand.vmem [shape: f32[128,1], index: 2, kind: input, shape index: {}]   ;;  %s1578_s4 = inlined_call_operand.vmem [shape: bf16[128,128], index: 4, kind: input, shape index: {}]   ;;  %s1579_s3 = inlined_call_operand.<no memory space> [shape: f32[1], index: 3, kind: input, shape index: {}]   ;;  %s1580_s1 = inlined_call_operand.vmem [shape: f32[1,128], index: 1, kind: input, shape index: {}]   ;;  %s1581_s0 = inlined_call_operand.vmem [shape: bf16[128,8], index: 0, kind: input, shape index: {}]   ;;  %s1582_s5 = inlined_call_operand.vmem [shape: f32[1,8], index: 5, kind: input, shape index: {}]   ;;  %s1583_s6 = inlined_call_operand.vmem [shape: f32[1,8], index: 6, kind: input, shape index: {}]   ;;  %s1584_s7 = inlined_call_operand.<no memory space> [shape: f32[1], index: 7, kind: input, shape index: {}]   ;;  %s1585_s8 = inlined_call_operand.vmem [shape: f32[128,1], index: 8, kind: output, shape index: {}]  }
   0x1   :  { %861 = vset.pattern.permute.xlu1 %v934_v0  ;;  %860 = vset.pattern.permute.xlu0 %v934_v0  ;;  %v120_v1 = vld [vmem:[%s1577_s2 + $0x40] sm:$0xff]  ;;  %v121_v3 = vld [vmem:[%s1577_s2 + $0x48] sm:$0xff]  ;;  %v115_v5 = vld [vmem:[%s1577_s2 + $0x18] sm:$0xff]  ;;  %v1064_v33 = vstv %s1579_s3 }
   0x2   :  { %v112_v2 = vld [vmem:[%s1577_s2] sm:$0xff]  ;;  %171 = vperm.xlu1 %861, %v120_v1   ;;  %v113_v4 = vld [vmem:[%s1577_s2 + $0x8] sm:$0xff]  ;;  %v114_v6 = vld [vmem:[%s1577_s2 + $0x10] sm:$0xff] }
   0x3   :  { %131 = vperm.xlu0 %860, %v112_v2   ;;  %v123_v7 = vld [vmem:[%s1577_s2 + $0x58] sm:$0xff]  ;;  %v122_v8 = vld [vmem:[%s1577_s2 + $0x50] sm:$0xff]  ;;  %v117_v9 = vld [vmem:[%s1577_s2 + $0x28] sm:$0xff] }
   0x4   :  { %v116_v10 = vld [vmem:[%s1577_s2 + $0x20] sm:$0xff]  ;;  %v125_v11 = vld [vmem:[%s1577_s2 + $0x68] sm:$0xff]  ;;  %v119_v13 = vld [vmem:[%s1577_s2 + $0x38] sm:$0xff] }
   0x5   :  { %v124_v12 = vld [vmem:[%s1577_s2 + $0x60] sm:$0xff]  ;;  %v118_v14 = vld [vmem:[%s1577_s2 + $0x30] sm:$0xff]  ;;  %v127_v15 = vld [vmem:[%s1577_s2 + $0x78] sm:$0xff] }
   0x6   :  { %176 = vperm.xlu1 %861, %v121_v3   ;;  %v126_v16 = vld [vmem:[%s1577_s2 + $0x70] sm:$0xff]  ;;  %v756_v17 = vld [vmem:[%s1578_s4] sm:$0xff]   ;;  %v787_v22 = vld [vmem:[%s1578_s4 + $0x8] sm:$0xff]  }
   0x7   :  { %136 = vperm.xlu0 %860, %v113_v4   ;;  %v790_v18 = vld [vmem:[%s1578_s4 + $0x20] sm:$0xff]   ;;  %v757_v19 = vunpack.c.l.bf16 %v756_v17  ;;  %v758_v21 = vunpack.c.h.bf16 %v756_v17  ;;  %v791_v24 = vld [vmem:[%s1578_s4 + $0x28] sm:$0xff]   ;;  %v761_v25 = vunpack.c.l.bf16 %v787_v22  ;;  %v762_v29 = vunpack.c.h.bf16 %v787_v22  ;;  %v788_v31 = vld [vmem:[%s1578_s4 + $0x10] sm:$0xff]  }
   0x8   :  { %v773_v20 = vunpack.c.l.bf16 %v790_v18  ;;  %v774_v23 = vunpack.c.h.bf16 %v790_v18  ;;  %v777_v27 = vunpack.c.l.bf16 %v791_v24  ;;  %v778_v36 = vunpack.c.h.bf16 %v791_v24  ;;  %v792_v37 = vld [vmem:[%s1578_s4 + $0x30] sm:$0xff]   ;;  %v1079_v38 = vld [vmem:[%s1580_s1] ss:$0 sm:$0xff]  ;;  %v789_v60 = vld [vmem:[%s1578_s4 + $0x18] sm:$0xff]  }
   0x9   :  { %vm64_vm0 = vcmp.ne.f32.partialorder %v757_v19, %v757_v19  ;;  %vm65_vm4 = vcmp.ne.f32.partialorder %v758_v21, %v758_v21  ;;  %vm66_vm8 = vcmp.ne.f32.partialorder %v761_v25, %v761_v25  ;;  %vm67_vm11 = vcmp.ne.f32.partialorder %v762_v29, %v762_v29 }
   0xa   :  { %146 = vperm.xlu1 %861, %v115_v5   ;;  %vm72_vm1 = vcmp.ne.f32.partialorder %v773_v20, %v773_v20  ;;  %vm1042_vm3 = vmxor %vm64_vm0, %vm935_vm2  ;;  %vm73_vm6 = vcmp.ne.f32.partialorder %v774_v23, %v774_v23  ;;  %vm74_vm10 = vcmp.ne.f32.partialorder %v777_v27, %v777_v27  ;;  %v1086_v40 = vunpack.c.l.bf16 %v788_v31 }
   0xb   :  { %141 = vperm.xlu0 %860, %v114_v6   ;;  %vm1047_vm5 = vmxor %vm72_vm1, %vm935_vm2  ;;  %v96_v32 = vsel %vm1042_vm3, %v757_v19, 0.0  ;;  %v1104_v49 = vunpack.c.l.bf16 %v792_v37  ;;  %v1106_v50 = vunpack.c.h.bf16 %v788_v31  ;;  %vm75_vm15 = vcmp.ne.f32.partialorder %v778_v36, %v778_v36 }
   0xc   :  { %vm1052_vm7 = vmxor %vm65_vm4, %vm935_vm2  ;;  %v104_v34 = vsel %vm1047_vm5, %v773_v20, 0.0  ;;  %v233_v41 = vmul.f32 %v1064_v33, %v96_v32  ;;  %vm68_vm0 = vcmp.ne.f32.partialorder %v1086_v40, %v1086_v40  ;;  %v1132_v0 = vunpack.c.h.bf16 %v792_v37 }
   0xd   :  { %vm1069_vm9 = vmxor %vm73_vm6, %vm935_vm2  ;;  %v97_v42 = vsel %vm1052_vm7, %v758_v21, 0.0  ;;  %v241_v43 = vmul.f32 %v1064_v33, %v104_v34  ;;  %vm76_vm4 = vcmp.ne.f32.partialorder %v1104_v49, %v1104_v49  ;;  %vm69_vm6 = vcmp.ne.f32.partialorder %v1106_v50, %v1106_v50 }
   0xe   :  { %186 = vperm.xlu1 %861, %v123_v7   ;;  %vm1082_vm12 = vmxor %vm66_vm8, %vm935_vm2  ;;  %v105_v44 = vsel %vm1069_vm9, %v774_v23, 0.0  ;;  %v234_v53 = vmul.f32 %v1064_v33, %v97_v42  ;;  %v1172_v20 = vunpack.c.h.bf16 %v789_v60 }
   0xf   :  { %181 = vperm.xlu0 %860, %v122_v8   ;;  %vm1095_vm13 = vmxor %vm74_vm10, %vm935_vm2  ;;  %v98_v54 = vsel %vm1082_vm12, %v761_v25, 0.0  ;;  %v242_v55 = vmul.f32 %v1064_v33, %v105_v44  ;;  %v793_v25 = vld [vmem:[%s1578_s4 + $0x38] sm:$0xff]  }
  0x10   :  { %vm1100_vm14 = vmxor %vm67_vm11, %vm935_vm2  ;;  %v106_v58 = vsel %vm1095_vm13, %v777_v27, 0.0  ;;  %v235_v6 = vmul.f32 %v1064_v33, %v98_v54  ;;  %v1205_v44 = vunpack.c.l.bf16 %v793_v25 }
  0x11   :  { %v99_v59 = vsel %vm1100_vm14, %v762_v29, 0.0  ;;  %vm1124_vm1 = vmxor %vm75_vm15, %vm935_vm2  ;;  %v243_v7 = vmul.f32 %v1064_v33, %v106_v58  ;;  %vm77_vm15 = vcmp.ne.f32.partialorder %v1132_v0, %v1132_v0 }
  0x12   :  { %156 = vperm.xlu1 %861, %v117_v9   ;;  %vm1140_vm8 = vmxor %vm68_vm0, %vm935_vm2  ;;  %v236_v8 = vmul.f32 %v1064_v33, %v99_v59  ;;  %v1147_v9 = vunpack.c.l.bf16 %v789_v60 }
  0x13   :  { %151 = vperm.xlu0 %860, %v116_v10   ;;  %vm1155_vm10 = vmxor %vm76_vm4, %vm935_vm2  ;;  %v100_v18 = vsel %vm1140_vm8, %v1086_v40, 0.0  ;;  %vm71_vm4 = vcmp.ne.f32.partialorder %v1172_v20, %v1172_v20 }
  0x14   :  { %vm1166_vm11 = vmxor %vm69_vm6, %vm935_vm2  ;;  %v108_v31 = vsel %vm1155_vm10, %v1104_v49, 0.0  ;;  %vm70_vm0 = vcmp.ne.f32.partialorder %v1147_v9, %v1147_v9 }
  0x15   :  { %vm1243_vm6 = vmxor %vm71_vm4, %vm935_vm2 }
  0x16   :  { %196 = vperm.xlu1 %861, %v125_v11  }
  0x17   :  { %191 = vperm.xlu0 %860, %v124_v12  }
  0x1a   :  { %166 = vperm.xlu1 %861, %v119_v13   ;;  %v107_v13 = vsel %vm1124_vm1, %v778_v36, 0.0  ;;  %v101_v36 = vsel %vm1166_vm11, %v1106_v50, 0.0 }
  0x1b   :  { %161 = vperm.xlu0 %860, %v118_v14   ;;  %v244_v29 = vmul.f32 %v1064_v33, %v107_v13 }
  0x1e   :  { %206 = vperm.xlu1 %861, %v127_v15  }
  0x1f   :  { %201 = vperm.xlu0 %860, %v126_v16  }
  0x7d   :  { %v172_v46 = vpop.permute.xlu1 %171 }
  0x7e   :  { %v132_v47 = vpop.permute.xlu0 %131  ;;  %v223_v51 = vadd.f32 %v1079_v38, %v172_v46 }
  0x7f   :  { %v215_v52 = vadd.f32 %v1079_v38, %v132_v47 }
  0x80   :  { %v257_v57 = vadd.f32 %v241_v43, %v223_v51  ;;  %v237_v51 = vmul.f32 %v1064_v33, %v100_v18 }
  0x81   :  { %v249_v56 = vadd.f32 %v233_v41, %v215_v52  ;;  %v177_v61 = vpop.permute.xlu1 %176  ;;  %v238_v52 = vmul.f32 %v1064_v33, %v101_v36 }
  0x82   :  { %v137_v62 = vpop.permute.xlu0 %136  ;;  %v224_v1 = vadd.f32 %v1079_v38, %v177_v61  ;;  %v273_v4 = vmul.f32 0.2, %v257_v57 }
  0x83   :  { %v216_v2 = vadd.f32 %v1079_v38, %v137_v62  ;;  %v265_v3 = vmul.f32 0.2, %v249_v56  ;;  %v245_v62 = vmul.f32 %v1064_v33, %v108_v31 }
  0x84   :  { %v258_v12 = vadd.f32 %v242_v55, %v224_v1  ;;  %v289_v17 = vmax.f32 %v257_v57, %v273_v4 }
  0x85   :  { %v281_v10 = vmax.f32 %v249_v56, %v265_v3  ;;  %v250_v11 = vadd.f32 %v234_v53, %v216_v2  ;;  %v147_v15 = vpop.permute.xlu1 %146  ;;  %v1219_v53 = vunpack.c.h.bf16 %v793_v25 }
  0x86   :  { %v142_v16 = vpop.permute.xlu0 %141  ;;  %v218_v21 = vadd.f32 %v1079_v38, %v147_v15  ;;  %v274_v27 = vmul.f32 0.2, %v258_v12  ;;  %v1195_v41 = vsel %vm1047_vm5, %v289_v17, -1e+30  ;;  %vm1225_vm5 = vmxor %vm70_vm0, %vm935_vm2 }
  0x87   :  { %v217_v22 = vadd.f32 %v1079_v38, %v142_v16  ;;  %v1178_v23 = vsel %vm1042_vm3, %v281_v10, -1e+30  ;;  %v266_v24 = vmul.f32 0.2, %v250_v11  ;;  %vm1201_vm3 = vmxor %vm77_vm15, %vm935_vm2 }
  0x88   :  { %313 = vmax.xlane.f32.xlu0 %v1178_v23  ;;  %v252_v34 = vadd.f32 %v236_v8, %v218_v21  ;;  %v290_v42 = vmax.f32 %v258_v12, %v274_v27  ;;  %v109_v57 = vsel %vm1201_vm3, %v1132_v0, 0.0 }
  0x89   :  { %v282_v26 = vmax.f32 %v250_v11, %v266_v24  ;;  %v251_v32 = vadd.f32 %v235_v6, %v217_v22  ;;  %v187_v37 = vpop.permute.xlu1 %186  ;;  %v102_v6 = vsel %vm1225_vm5, %v1147_v9, 0.0  ;;  %v103_v11 = vsel %vm1243_vm6, %v1172_v20, 0.0 }
  0x8a   :  { %v182_v40 = vpop.permute.xlu0 %181  ;;  %v226_v46 = vadd.f32 %v1079_v38, %v187_v37  ;;  %v268_v50 = vmul.f32 0.2, %v252_v34  ;;  %v1234_v60 = vsel %vm1069_vm9, %v290_v42, -1e+30  ;;  %vm79_vm9 = vcmp.ne.f32.partialorder %v1219_v53, %v1219_v53 }
  0x8b   :  { %v225_v28 = vadd.f32 %v1079_v38, %v182_v40  ;;  %v1213_v47 = vsel %vm1052_vm7, %v282_v26, -1e+30  ;;  %v267_v49 = vmul.f32 0.2, %v251_v32  ;;  %vm78_vm7 = vcmp.ne.f32.partialorder %v1205_v44, %v1205_v44 }
  0x8c   :  { %315 = vmax.xlane.f32.xlu1 %v1213_v47  ;;  %329 = vmax.xlane.f32.xlu0 %v1195_v41  ;;  %v260_v56 = vadd.f32 %v244_v29, %v226_v46  ;;  %v284_v61 = vmax.f32 %v252_v34, %v268_v50  ;;  %v239_v24 = vmul.f32 %v1064_v33, %v102_v6 }
  0x8d   :  { %v283_v54 = vmax.f32 %v251_v32, %v267_v49  ;;  %v259_v55 = vadd.f32 %v243_v7, %v225_v28  ;;  %v157_v58 = vpop.permute.xlu1 %156  ;;  %v246_v7 = vmul.f32 %v1064_v33, %v109_v57  ;;  %v240_v25 = vmul.f32 %v1064_v33, %v103_v11 }
  0x8e   :  { %v152_v59 = vpop.permute.xlu0 %151  ;;  %v220_v0 = vadd.f32 %v1079_v38, %v157_v58  ;;  %v276_v4 = vmul.f32 0.2, %v260_v56  ;;  %v1266_v15 = vsel %vm1100_vm14, %v284_v61, -1e+30  ;;  %vm1283_vm14 = vmxor %vm79_vm9, %vm935_vm2 }
  0x8f   :  { %v219_v35 = vadd.f32 %v1079_v38, %v152_v59  ;;  %v1251_v2 = vsel %vm1082_vm12, %v283_v54, -1e+30  ;;  %v275_v3 = vmul.f32 0.2, %v259_v55  ;;  %vm1272_vm12 = vmxor %vm78_vm7, %vm935_vm2  ;;  %v111_v37 = vsel %vm1283_vm14, %v1219_v53, 0.0 }
  0x90   :  { %317 = vmax.xlane.f32.xlu1 %v1251_v2  ;;  %331 = vmax.xlane.f32.xlu0 %v1234_v60  ;;  %v254_v39 = vadd.f32 %v238_v52, %v220_v0  ;;  %v292_v16 = vmax.f32 %v260_v56, %v276_v4  ;;  %v110_v31 = vsel %vm1272_vm12, %v1205_v44, 0.0  ;;  %v248_v52 = vmul.f32 %v1064_v33, %v111_v37 }
  0x91   :  { %v291_v8 = vmax.f32 %v259_v55, %v275_v3  ;;  %v253_v10 = vadd.f32 %v237_v51, %v219_v35  ;;  %v197_v12 = vpop.permute.xlu1 %196  ;;  %v247_v28 = vmul.f32 %v1064_v33, %v110_v31  ;;  %vm656_vm2 = vcmask 64512  }
  0x92   :  { %v192_v13 = vpop.permute.xlu0 %191  ;;  %v228_v17 = vadd.f32 %v1079_v38, %v197_v12  ;;  %v270_v22 = vmul.f32 0.2, %v254_v39  ;;  %v1296_v34 = vsel %vm1124_vm1, %v292_v16, -1e+30 }
  0x93   :  { %v227_v18 = vadd.f32 %v1079_v38, %v192_v13  ;;  %v1280_v20 = vsel %vm1095_vm13, %v291_v8, -1e+30  ;;  %v269_v48 = vmul.f32 0.2, %v253_v10  ;;  %v862_v8 = vld [vmem:[%s1581_s0 + $0x38] sm:$0xff]   ;;  %vm723_vm13 = vcmask 7168  }
  0x94   :  { %333 = vmax.xlane.f32.xlu1 %v1280_v20  ;;  %319 = vmax.xlane.f32.xlu0 %v1266_v15  ;;  %v262_v45 = vadd.f32 %v246_v7, %v228_v17  ;;  %v286_v36 = vmax.f32 %v254_v39, %v270_v22 }
  0x95   :  { %v285_v27 = vmax.f32 %v253_v10, %v269_v48  ;;  %v261_v29 = vadd.f32 %v245_v62, %v227_v18  ;;  %v167_v26 = vpop.permute.xlu1 %166  ;;  %810 = vmatprep.subr.bf16.mxu0 %v862_v8  ;;  %842 = vmatprep.subr.bf16.mxu1 %v862_v8 }
  0x96   :  { %v162_v32 = vpop.permute.xlu0 %161  ;;  %v222_v40 = vadd.f32 %v1079_v38, %v167_v26  ;;  %v278_v63 = vmul.f32 0.2, %v262_v45  ;;  %v1313_v5 = vsel %vm1166_vm11, %v286_v36, -1e+30  ;;  %811 = vmatpush3.bf16.msra.mxu0 %v862_v8  ;;  %850 = vmatpush3.bf16.msra.mxu1 %v862_v8 }
  0x97   :  { %v221_v42 = vadd.f32 %v1079_v38, %v162_v32  ;;  %v1305_v46 = vsel %vm1140_vm8, %v285_v27, -1e+30  ;;  %v277_v44 = vmul.f32 0.2, %v261_v29 }
  0x98   :  { %321 = vmax.xlane.f32.xlu1 %v1305_v46  ;;  %335 = vmax.xlane.f32.xlu0 %v1296_v34  ;;  %v256_v51 = vadd.f32 %v240_v25, %v222_v40  ;;  %v294_v55 = vmax.f32 %v262_v45, %v278_v63 }
  0x99   :  { %v293_v49 = vmax.f32 %v261_v29, %v277_v44  ;;  %v255_v50 = vadd.f32 %v239_v24, %v221_v42  ;;  %v207_v53 = vpop.permute.xlu1 %206 }
  0x9a   :  { %v202_v54 = vpop.permute.xlu0 %201  ;;  %v230_v56 = vadd.f32 %v1079_v38, %v207_v53  ;;  %v272_v33 = vmul.f32 0.2, %v256_v51  ;;  %v1325_v0 = vsel %vm1201_vm3, %v294_v55, -1e+30 }
  0x9b   :  { %v229_v57 = vadd.f32 %v1079_v38, %v202_v54  ;;  %v1319_v58 = vsel %vm1155_vm10, %v293_v49, -1e+30  ;;  %v271_v59 = vmul.f32 0.2, %v255_v50 }
  0x9c   :  { %337 = vmax.xlane.f32.xlu1 %v1319_v58  ;;  %323 = vmax.xlane.f32.xlu0 %v1313_v5  ;;  %v264_v19 = vadd.f32 %v248_v52, %v230_v56  ;;  %v288_v35 = vmax.f32 %v256_v51, %v272_v33 }
  0x9d   :  { %v287_v61 = vmax.f32 %v255_v50, %v271_v59  ;;  %v263_v62 = vadd.f32 %v247_v28, %v229_v57  ;;  %v863_v59 = vld [vmem:[%s1581_s0 + $0x30] sm:$0xff]  }
  0x9e   :  { %v280_v3 = vmul.f32 0.2, %v264_v19  ;;  %v1339_v43 = vsel %vm1243_vm6, %v288_v35, -1e+30  ;;  %812 = vmatprep.subr.bf16.mxu0 %v863_v59  ;;  %843 = vmatprep.subr.bf16.mxu1 %v863_v59  ;;  %v864_v35 = vld [vmem:[%s1581_s0 + $0x28] sm:$0xff]  }
  0x9f   :  { %v1329_v38 = vsel %vm1225_vm5, %v287_v61, -1e+30  ;;  %v279_v14 = vmul.f32 0.2, %v263_v62  ;;  %813 = vmatpush3.bf16.msra.mxu0 %v863_v59  ;;  %851 = vmatpush3.bf16.msra.mxu1 %v863_v59 }
  0xa0   :  { %325 = vmax.xlane.f32.xlu1 %v1329_v38  ;;  %339 = vmax.xlane.f32.xlu0 %v1325_v0  ;;  %v296_v7 = vmax.f32 %v264_v19, %v280_v3 }
  0xa1   :  { %v295_v4 = vmax.f32 %v263_v62, %v279_v14  ;;  %814 = vmatprep.subr.bf16.mxu0 %v864_v35  ;;  %844 = vmatprep.subr.bf16.mxu1 %v864_v35 }
  0xa2   :  { %v1345_v30 = vsel %vm1283_vm14, %v296_v7, -1e+30  ;;  %v865_v7 = vld [vmem:[%s1581_s0 + $0x20] sm:$0xff]  }
  0xa3   :  { %v1335_v6 = vsel %vm1272_vm12, %v295_v4, -1e+30  ;;  %815 = vmatpush3.bf16.msra.mxu0 %v864_v35  ;;  %852 = vmatpush3.bf16.msra.mxu1 %v864_v35 }
  0xa4   :  { %341 = vmax.xlane.f32.xlu1 %v1335_v6  ;;  %327 = vmax.xlane.f32.xlu0 %v1339_v43 }
  0xa5   :  { %816 = vmatprep.subr.bf16.mxu0 %v865_v7  ;;  %845 = vmatprep.subr.bf16.mxu1 %v865_v7 }
  0xa7   :  { %817 = vmatpush3.bf16.msra.mxu0 %v865_v7  ;;  %853 = vmatpush3.bf16.msra.mxu1 %v865_v7 }
  0xa8   :  { %343 = vmax.xlane.f32.xlu0 %v1345_v30 }
 0x111   :  { %v314_v1 = vpop.xlane.xlu0 %313 }
 0x112   :  { %v345_v10 = vsub.f32 %v1178_v23, %v314_v1  ;;  %v866_v1 = vld [vmem:[%s1581_s0 + $0x18] sm:$0xff]  }
 0x113   :  { %818 = vmatprep.subr.bf16.mxu0 %v866_v1  ;;  %846 = vmatprep.subr.bf16.mxu1 %v866_v1 }
 0x114   :  { %v361_v39 = vmul.f32 1.442695, %v345_v10  ;;  %819 = vmatpush3.bf16.msra.mxu0 %v866_v1  ;;  %854 = vmatpush3.bf16.msra.mxu1 %v866_v1 }
 0x115   :  { %v316_v11 = vpop.xlane.xlu1 %315  ;;  %v330_v12 = vpop.xlane.xlu0 %329 }
 0x116   :  { %870 = vpow2.f32 %v361_v39  ;;  %v346_v13 = vsub.f32 %v1213_v47, %v316_v11  ;;  %v353_v16 = vsub.f32 %v1195_v41, %v330_v12  ;;  %v867_v11 = vld [vmem:[%s1581_s0 + $0x10] sm:$0xff]  }
 0x117   :  { %820 = vmatprep.subr.bf16.mxu0 %v867_v11  ;;  %847 = vmatprep.subr.bf16.mxu1 %v867_v11 }
 0x118   :  { %v363_v9 = vmul.f32 1.442695, %v346_v13  ;;  %v377_v17 = vmul.f32 1.442695, %v353_v16  ;;  %821 = vmatpush3.bf16.msra.mxu0 %v867_v11  ;;  %855 = vmatpush3.bf16.msra.mxu1 %v867_v11  ;;  %v868_v13 = vld [vmem:[%s1581_s0 + $0x8] sm:$0xff]   ;;  %v869_v16 = vld [vmem:[%s1581_s0] sm:$0xff]  }
 0x119   :  { %v318_v18 = vpop.xlane.xlu1 %317  ;;  %v332_v48 = vpop.xlane.xlu0 %331  ;;  %822 = vmatprep.subr.bf16.mxu0 %v868_v13  ;;  %848 = vmatprep.subr.bf16.mxu1 %v868_v13 }
 0x11a   :  { %872 = vpow2.f32 %v363_v9  ;;  %v347_v21 = vsub.f32 %v1251_v2, %v318_v18  ;;  %v354_v22 = vsub.f32 %v1234_v60, %v332_v48 }
 0x11b   :  { %874 = vpow2.f32 %v377_v17 }
 0x11c   :  { %v365_v24 = vmul.f32 1.442695, %v347_v21  ;;  %v379_v23 = vmul.f32 1.442695, %v354_v22  ;;  %823 = vmatpush3.bf16.msra.mxu0 %v868_v13  ;;  %856 = vmatpush3.bf16.msra.mxu1 %v868_v13 }
 0x11d   :  { %v334_v25 = vpop.xlane.xlu1 %333  ;;  %v320_v27 = vpop.xlane.xlu0 %319  ;;  %824 = vmatprep.subr.bf16.mxu0 %v869_v16  ;;  %849 = vmatprep.subr.bf16.mxu1 %v869_v16 }
 0x11e   :  { %876 = vpow2.f32 %v365_v24  ;;  %v355_v29 = vsub.f32 %v1280_v20, %v334_v25  ;;  %v348_v47 = vsub.f32 %v1266_v15, %v320_v27 }
 0x11f   :  { %878 = vpow2.f32 %v379_v23 }
 0x120   :  { %v381_v41 = vmul.f32 1.442695, %v355_v29  ;;  %v367_v45 = vmul.f32 1.442695, %v348_v47  ;;  %825 = vmatpush3.bf16.msra.mxu0 %v869_v16  ;;  %857 = vmatpush3.bf16.msra.mxu1 %v869_v16 }
 0x121   :  { %v322_v31 = vpop.xlane.xlu1 %321  ;;  %v336_v26 = vpop.xlane.xlu0 %335 }
 0x122   :  { %880 = vpow2.f32 %v381_v41  ;;  %v349_v2 = vsub.f32 %v1305_v46, %v322_v31  ;;  %v356_v60 = vsub.f32 %v1296_v34, %v336_v26 }
 0x123   :  { %v1360_v32 = vpop.eup %870  ;;  %882 = vpow2.f32 %v367_v45 }
 0x124   :  { %v369_v36 = vmul.f32 1.442695, %v349_v2  ;;  %v383_v37 = vmul.f32 1.442695, %v356_v60  ;;  %393 = vadd.xlane.f32.xlu1 %v1360_v32 }
 0x125   :  { %v338_v20 = vpop.xlane.xlu1 %337  ;;  %v324_v40 = vpop.xlane.xlu0 %323 }
 0x126   :  { %884 = vpow2.f32 %v369_v36  ;;  %v357_v15 = vsub.f32 %v1319_v58, %v338_v20  ;;  %v350_v42 = vsub.f32 %v1313_v5, %v324_v40 }
 0x127   :  { %v1365_v44 = vpop.eup %872  ;;  %886 = vpow2.f32 %v383_v37 }
 0x128   :  { %v1367_v46 = vpop.eup %874  ;;  %v385_v34 = vmul.f32 1.442695, %v357_v15  ;;  %v371_v63 = vmul.f32 1.442695, %v350_v42  ;;  %395 = vadd.xlane.f32.xlu0 %v1365_v44 }
 0x129   :  { %409 = vadd.xlane.f32.xlu1 %v1367_v46  ;;  %v326_v28 = vpop.xlane.xlu1 %325  ;;  %v340_v49 = vpop.xlane.xlu0 %339 }
 0x12a   :  { %888 = vpow2.f32 %v385_v34  ;;  %v351_v50 = vsub.f32 %v1329_v38, %v326_v28  ;;  %v358_v51 = vsub.f32 %v1325_v0, %v340_v49 }
 0x12b   :  { %v1373_v52 = vpop.eup %876  ;;  %890 = vpow2.f32 %v371_v63 }
 0x12c   :  { %v1375_v53 = vpop.eup %878  ;;  %v373_v54 = vmul.f32 1.442695, %v351_v50  ;;  %v387_v5 = vmul.f32 1.442695, %v358_v51 }
 0x12d   :  { %397 = vadd.xlane.f32.xlu1 %v1373_v52  ;;  %411 = vadd.xlane.f32.xlu0 %v1375_v53  ;;  %v342_v55 = vpop.xlane.xlu1 %341  ;;  %v328_v56 = vpop.xlane.xlu0 %327 }
 0x12e   :  { %892 = vpow2.f32 %v373_v54  ;;  %v359_v57 = vsub.f32 %v1335_v6, %v342_v55  ;;  %v352_v58 = vsub.f32 %v1339_v43, %v328_v56 }
 0x12f   :  { %v1384_v33 = vpop.eup %880  ;;  %894 = vpow2.f32 %v387_v5 }
 0x130   :  { %v1386_v61 = vpop.eup %882  ;;  %v389_v62 = vmul.f32 1.442695, %v359_v57  ;;  %v375_v19 = vmul.f32 1.442695, %v352_v58 }
 0x131   :  { %413 = vadd.xlane.f32.xlu1 %v1384_v33  ;;  %399 = vadd.xlane.f32.xlu0 %v1386_v61  ;;  %v344_v0 = vpop.xlane.xlu0 %343 }
 0x132   :  { %896 = vpow2.f32 %v389_v62  ;;  %v360_v38 = vsub.f32 %v1345_v30, %v344_v0 }
 0x133   :  { %v1391_v14 = vpop.eup %884  ;;  %898 = vpow2.f32 %v375_v19 }
 0x134   :  { %v1396_v3 = vpop.eup %886  ;;  %v391_v4 = vmul.f32 1.442695, %v360_v38 }
 0x135   :  { %401 = vadd.xlane.f32.xlu1 %v1391_v14  ;;  %415 = vadd.xlane.f32.xlu0 %v1396_v3 }
 0x136   :  { %900 = vpow2.f32 %v391_v4 }
 0x137   :  { %v1400_v6 = vpop.eup %888 }
 0x138   :  { %v1402_v43 = vpop.eup %890 }
 0x139   :  { %417 = vadd.xlane.f32.xlu1 %v1400_v6  ;;  %403 = vadd.xlane.f32.xlu0 %v1402_v43 }
 0x13b   :  { %v1409_v30 = vpop.eup %892 }
 0x13c   :  { %v1411_v8 = vpop.eup %894 }
 0x13d   :  { %405 = vadd.xlane.f32.xlu1 %v1409_v30  ;;  %419 = vadd.xlane.f32.xlu0 %v1411_v8 }
 0x13f   :  { %v1418_v10 = vpop.eup %896 }
 0x140   :  { %v1420_v39 = vpop.eup %898 }
 0x141   :  { %421 = vadd.xlane.f32.xlu1 %v1418_v10  ;;  %407 = vadd.xlane.f32.xlu0 %v1420_v39 }
 0x143   :  { %v1427_v12 = vpop.eup %900 }
 0x145   :  { %423 = vadd.xlane.f32.xlu0 %v1427_v12 }
 0x1ad   :  { %v394_v9 = vpop.xlane.xlu1 %393 }
 0x1ae   :  { %902 = vrcp.f32 %v394_v9 }
 0x1b1   :  { %v396_v17 = vpop.xlane.xlu0 %395 }
 0x1b2   :  { %v410_v18 = vpop.xlane.xlu1 %409  ;;  %904 = vrcp.f32 %v396_v17 }
 0x1b3   :  { %906 = vrcp.f32 %v410_v18 }
 0x1b6   :  { %v398_v48 = vpop.xlane.xlu1 %397  ;;  %v412_v21 = vpop.xlane.xlu0 %411 }
 0x1b7   :  { %908 = vrcp.f32 %v412_v21 }
 0x1b8   :  { %910 = vrcp.f32 %v398_v48 }
 0x1ba   :  { %v414_v22 = vpop.xlane.xlu1 %413  ;;  %v400_v24 = vpop.xlane.xlu0 %399 }
 0x1bb   :  { %912 = vrcp.f32 %v400_v24  ;;  %v903_v23 = vpop.eup %902 }
 0x1bc   :  { %914 = vrcp.f32 %v414_v22  ;;  %v441_v47 = vmul.f32 %v903_v23, %v1360_v32 }
 0x1be   :  { %v402_v25 = vpop.xlane.xlu1 %401  ;;  %v416_v27 = vpop.xlane.xlu0 %415 }
 0x1bf   :  { %v905_v29 = vpop.eup %904  ;;  %916 = vrcp.f32 %v416_v27 }
 0x1c0   :  { %v442_v41 = vmul.f32 %v905_v29, %v1365_v44  ;;  %918 = vrcp.f32 %v402_v25  ;;  %v907_v2 = vpop.eup %906 }
 0x1c1   :  { %v449_v20 = vmul.f32 %v907_v2, %v1367_v46 }
 0x1c2   :  { %v418_v45 = vpop.xlane.xlu1 %417  ;;  %v404_v31 = vpop.xlane.xlu0 %403  ;;  %v457_v26 = vpack.c.bf16 %v442_v41, %v441_v47 }
 0x1c3   :  { %920 = vrcp.f32 %v404_v31 }
 0x1c4   :  { %826 = vmatprep.mubr.bf16.mxu0 %v457_v26  ;;  %v909_v60 = vpop.eup %908  ;;  %922 = vrcp.f32 %v418_v45 }
 0x1c5   :  { %v450_v40 = vmul.f32 %v909_v60, %v1375_v53  ;;  %v911_v15 = vpop.eup %910 }
 0x1c6   :  { %v406_v36 = vpop.xlane.xlu1 %405  ;;  %v420_v37 = vpop.xlane.xlu0 %419  ;;  %v443_v63 = vmul.f32 %v911_v15, %v1373_v52 }
 0x1c7   :  { %924 = vrcp.f32 %v420_v37  ;;  %v461_v32 = vpack.c.bf16 %v450_v40, %v449_v20 }
 0x1c8   :  { %v913_v42 = vpop.eup %912  ;;  %926 = vrcp.f32 %v406_v36 }
 0x1c9   :  { %834 = vmatprep.mubr.bf16.mxu1 %v461_v32  ;;  %v444_v28 = vmul.f32 %v913_v42, %v1386_v61  ;;  %v915_v49 = vpop.eup %914 }
 0x1ca   :  { %v422_v44 = vpop.xlane.xlu1 %421  ;;  %v408_v34 = vpop.xlane.xlu0 %407  ;;  %v451_v53 = vmul.f32 %v915_v49, %v1384_v33 }
 0x1cb   :  { %928 = vrcp.f32 %v408_v34  ;;  %v458_v50 = vpack.c.bf16 %v444_v28, %v443_v63 }
 0x1cc   :  { %v917_v51 = vpop.eup %916  ;;  %930 = vrcp.f32 %v422_v44 }
 0x1cd   :  { %827 = vmatmul.mubr.bf16.vlgmr.msra.gmra.mxu0 %v458_v50  ;;  %v452_v54 = vmul.f32 %v917_v51, %v1396_v3  ;;  %v919_v5 = vpop.eup %918 }
 0x1ce   :  { %v424_v46 = vpop.xlane.xlu0 %423  ;;  %v445_v52 = vmul.f32 %v919_v5, %v1391_v14 }
 0x1cf   :  { %932 = vrcp.f32 %v424_v46  ;;  %v462_v55 = vpack.c.bf16 %v452_v54, %v451_v53 }
 0x1d0   :  { %v921_v56 = vpop.eup %920 }
 0x1d1   :  { %835 = vmatmul.mubr.bf16.vlgmr.msra.gmra.mxu1 %v462_v55  ;;  %v446_v57 = vmul.f32 %v921_v56, %v1402_v43  ;;  %v923_v58 = vpop.eup %922 }
 0x1d2   :  { %v453_v62 = vmul.f32 %v923_v58, %v1400_v6  ;;  %v1455_v6 = vld [vmem:[%s1582_s5] ss:$0 sm:$0xff] }
 0x1d3   :  { %v459_v59 = vpack.c.bf16 %v446_v57, %v445_v52 }
 0x1d4   :  { %v925_v61 = vpop.eup %924 }
 0x1d5   :  { %830 = vmatprep.mubr.bf16.mxu0 %v459_v59  ;;  %v454_v19 = vmul.f32 %v925_v61, %v1411_v8  ;;  %v927_v33 = vpop.eup %926 }
 0x1d6   :  { %v447_v3 = vmul.f32 %v927_v33, %v1409_v30  ;;  %v1460_v30 = vld [vmem:[%s1583_s6] ss:$0 sm:$0xff] }
 0x1d7   :  { %v463_v0 = vpack.c.bf16 %v454_v19, %v453_v62 }
 0x1d8   :  { %v929_v38 = vpop.eup %928 }
 0x1d9   :  { %v931_v35 = vpop.eup %930  ;;  %838 = vmatprep.mubr.bf16.mxu1 %v463_v0  ;;  %v448_v4 = vmul.f32 %v929_v38, %v1420_v39 }
 0x1da   :  { %v455_v43 = vmul.f32 %v931_v35, %v1418_v10 }
 0x1db   :  { %v460_v7 = vpack.c.bf16 %v448_v4, %v447_v3 }
 0x1dc   :  { %v933_v14 = vpop.eup %932 }
 0x1dd   :  { %v456_v1 = vmul.f32 %v933_v14, %v1427_v12  ;;  %831 = vmatmul.mubr.bf16.gmra.mxu0 %v460_v7 }
 0x1df   :  { %v464_v11 = vpack.c.bf16 %v456_v1, %v455_v43 }
 0x1e1   :  { %839 = vmatmul.mubr.bf16.gmra.mxu1 %v464_v11 }
 0x28d   :  { %v828_v8 = vpop.f32.mrf.mxu0 }
 0x28e   :  { %v579_v39 = vadd.f32 %v828_v8, %v1455_v6 }
 0x28f   :  { %v570_v13 = vpop.f32.mrf.mxu0 }
 0x290   :  { %v642_v10 = vmul.f32 %v1460_v30, %v579_v39  ;;  %v571_v12 = vadd.f32 %v1455_v6, %v570_v13 }
 0x291   :  { %v829_v16 = vpop.f32.mrf.mxu0  ;;  %v836_v9 = vpop.f32.mrf.mxu1 }
 0x292   :  { %v582_v17 = vadd.f32 %v829_v16, %v1455_v6  ;;  %v611_v18 = vadd.f32 %v836_v9, %v1455_v6  ;;  %v663_v48 = vsel %vm656_vm2, %v642_v10, 0.0  ;;  %v640_v29 = vmul.f32 %v1460_v30, %v571_v12 }
 0x293   :  { %v602_v21 = vpop.f32.mrf.mxu1  ;;  %664 = vadd.xlane.f32.xlu1 %v663_v48  ;;  %v573_v22 = vpop.f32.mrf.mxu0 }
 0x294   :  { %v650_v24 = vmul.f32 %v1460_v30, %v611_v18  ;;  %v643_v23 = vmul.f32 %v1460_v30, %v582_v17  ;;  %v603_v25 = vadd.f32 %v1455_v6, %v602_v21  ;;  %v574_v47 = vadd.f32 %v1455_v6, %v573_v22 }
 0x295   :  { %v837_v27 = vpop.f32.mrf.mxu1  ;;  %v657_v60 = vsel %vm656_vm2, %v640_v29, 0.0 }
 0x296   :  { %v614_v41 = vadd.f32 %v837_v27, %v1455_v6  ;;  %v687_v45 = vsel %vm656_vm2, %v650_v24, 0.0  ;;  %v666_v31 = vsel %vm656_vm2, %v643_v23, 0.0  ;;  %v641_v20 = vmul.f32 %v1460_v30, %v574_v47 }
 0x297   :  { %v605_v26 = vpop.f32.mrf.mxu1  ;;  %688 = vadd.xlane.f32.xlu1 %v687_v45  ;;  %667 = vadd.xlane.f32.xlu0 %v666_v31  ;;  %v648_v40 = vmul.f32 %v1460_v30, %v603_v25 }
 0x298   :  { %v651_v2 = vmul.f32 %v1460_v30, %v614_v41  ;;  %v606_v36 = vadd.f32 %v1455_v6, %v605_v26  ;;  %v660_v42 = vsel %vm656_vm2, %v641_v20, 0.0 }
 0x299   :  { %v681_v44 = vsel %vm656_vm2, %v648_v40, 0.0 }
 0x29a   :  { %v690_v37 = vsel %vm656_vm2, %v651_v2, 0.0  ;;  %v649_v34 = vmul.f32 %v1460_v30, %v606_v36 }
 0x29b   :  { %691 = vadd.xlane.f32.xlu0 %v690_v37  ;;  %658 = vadd.xlane.f32.xlu1 %v657_v60 }
 0x29c   :  { %v684_v54 = vsel %vm656_vm2, %v649_v34, 0.0 }
 0x29d   :  { %v832_v15 = vpop.f32.mrf.mxu0 }
 0x29e   :  { %v595_v32 = vadd.f32 %v832_v15, %v1455_v6 }
 0x29f   :  { %v586_v63 = vpop.f32.mrf.mxu0  ;;  %661 = vadd.xlane.f32.xlu0 %v660_v42  ;;  %682 = vadd.xlane.f32.xlu1 %v681_v44 }
 0x2a0   :  { %v587_v28 = vadd.f32 %v1455_v6, %v586_v63  ;;  %v646_v50 = vmul.f32 %v1460_v30, %v595_v32 }
 0x2a1   :  { %v840_v49 = vpop.f32.mrf.mxu1  ;;  %v833_v51 = vpop.f32.mrf.mxu0 }
 0x2a2   :  { %v598_v46 = vadd.f32 %v833_v51, %v1455_v6  ;;  %v675_v5 = vsel %vm656_vm2, %v646_v50, 0.0  ;;  %v644_v55 = vmul.f32 %v1460_v30, %v587_v28  ;;  %v627_v61 = vadd.f32 %v840_v49, %v1455_v6 }
 0x2a3   :  { %v618_v53 = vpop.f32.mrf.mxu1  ;;  %v589_v56 = vpop.f32.mrf.mxu0  ;;  %685 = vadd.xlane.f32.xlu0 %v684_v54  ;;  %676 = vadd.xlane.f32.xlu1 %v675_v5 }
 0x2a4   :  { %v619_v52 = vadd.f32 %v1455_v6, %v618_v53  ;;  %v590_v57 = vadd.f32 %v1455_v6, %v589_v56  ;;  %v647_v59 = vmul.f32 %v1460_v30, %v598_v46  ;;  %v669_v33 = vsel %vm656_vm2, %v644_v55, 0.0 }
 0x2a5   :  { %v841_v58 = vpop.f32.mrf.mxu1  ;;  %v654_v3 = vmul.f32 %v1460_v30, %v627_v61 }
 0x2a6   :  { %v678_v19 = vsel %vm656_vm2, %v647_v59, 0.0  ;;  %v645_v0 = vmul.f32 %v1460_v30, %v590_v57  ;;  %v652_v38 = vmul.f32 %v1460_v30, %v619_v52  ;;  %v630_v4 = vadd.f32 %v841_v58, %v1455_v6 }
 0x2a7   :  { %v621_v62 = vpop.f32.mrf.mxu1  ;;  %679 = vadd.xlane.f32.xlu0 %v678_v19  ;;  %670 = vadd.xlane.f32.xlu1 %v669_v33  ;;  %v699_v11 = vsel %vm656_vm2, %v654_v3, 0.0 }
 0x2a8   :  { %v622_v35 = vadd.f32 %v1455_v6, %v621_v62  ;;  %v672_v14 = vsel %vm656_vm2, %v645_v0, 0.0  ;;  %v693_v7 = vsel %vm656_vm2, %v652_v38, 0.0  ;;  %v655_v8 = vmul.f32 %v1460_v30, %v630_v4 }
 0x2a9   :  { %v706_v6 = vstv %s1584_s7 }
 0x2aa   :  { %v653_v43 = vmul.f32 %v1460_v30, %v622_v35  ;;  %v702_v39 = vsel %vm656_vm2, %v655_v8, 0.0 }
 0x2ab   :  { %673 = vadd.xlane.f32.xlu0 %v672_v14  ;;  %694 = vadd.xlane.f32.xlu1 %v693_v7 }
 0x2ac   :  { %v696_v1 = vsel %vm656_vm2, %v653_v43, 0.0 }
 0x2af   :  { %697 = vadd.xlane.f32.xlu0 %v696_v1  ;;  %700 = vadd.xlane.f32.xlu1 %v699_v11 }
 0x2b3   :  { %703 = vadd.xlane.f32.xlu0 %v702_v39 }
 0x31c   :  { %v665_v13 = vpop.xlane.xlu1 %664 }
 0x31d   :  { %v709_v10 = vadd.f32 %v706_v6, %v665_v13 }
 0x31f   :  { %726 = vst.msk [vmem:[%s1585_s8 + $0x10] sm:$0xff] %vm723_vm13, %v709_v10 }
 0x320   :  { %v689_v12 = vpop.xlane.xlu1 %688  ;;  %v668_v16 = vpop.xlane.xlu0 %667 }
 0x321   :  { %v717_v30 = vadd.f32 %v706_v6, %v689_v12  ;;  %v710_v9 = vadd.f32 %v706_v6, %v668_v16 }
 0x323   :  { %734 = vst.msk [vmem:[%s1585_s8 + $0x50] sm:$0xff] %vm723_vm13, %v717_v30  ;;  %727 = vst.msk [vmem:[%s1585_s8 + $0x18] sm:$0xff] %vm723_vm13, %v710_v9 }
 0x324   :  { %v692_v17 = vpop.xlane.xlu0 %691  ;;  %v659_v18 = vpop.xlane.xlu1 %658 }
 0x325   :  { %v718_v48 = vadd.f32 %v706_v6, %v692_v17  ;;  %v707_v21 = vadd.f32 %v706_v6, %v659_v18 }
 0x327   :  { %735 = vst.msk [vmem:[%s1585_s8 + $0x58] sm:$0xff] %vm723_vm13, %v718_v48  ;;  %724 = vst.msk [vmem:[%s1585_s8] sm:$0xff] %vm723_vm13, %v707_v21 }
 0x328   :  { %v662_v22 = vpop.xlane.xlu0 %661  ;;  %v683_v24 = vpop.xlane.xlu1 %682 }
 0x329   :  { %v708_v23 = vadd.f32 %v706_v6, %v662_v22  ;;  %v715_v25 = vadd.f32 %v706_v6, %v683_v24 }
 0x32b   :  { %725 = vst.msk [vmem:[%s1585_s8 + $0x8] sm:$0xff] %vm723_vm13, %v708_v23  ;;  %732 = vst.msk [vmem:[%s1585_s8 + $0x40] sm:$0xff] %vm723_vm13, %v715_v25 }
 0x32c   :  { %v686_v27 = vpop.xlane.xlu0 %685  ;;  %v677_v29 = vpop.xlane.xlu1 %676 }
 0x32d   :  { %v716_v47 = vadd.f32 %v706_v6, %v686_v27  ;;  %v713_v41 = vadd.f32 %v706_v6, %v677_v29 }
 0x32f   :  { %733 = vst.msk [vmem:[%s1585_s8 + $0x48] sm:$0xff] %vm723_vm13, %v716_v47  ;;  %730 = vst.msk [vmem:[%s1585_s8 + $0x30] sm:$0xff] %vm723_vm13, %v713_v41 }
 0x330   :  { %v680_v45 = vpop.xlane.xlu0 %679  ;;  %v671_v31 = vpop.xlane.xlu1 %670 }
 0x331   :  { %v714_v26 = vadd.f32 %v706_v6, %v680_v45  ;;  %v711_v2 = vadd.f32 %v706_v6, %v671_v31 }
 0x333   :  { %731 = vst.msk [vmem:[%s1585_s8 + $0x38] sm:$0xff] %vm723_vm13, %v714_v26  ;;  %728 = vst.msk [vmem:[%s1585_s8 + $0x20] sm:$0xff] %vm723_vm13, %v711_v2 }
 0x334   :  { %v674_v60 = vpop.xlane.xlu0 %673  ;;  %v695_v36 = vpop.xlane.xlu1 %694 }
 0x335   :  { %v712_v37 = vadd.f32 %v706_v6, %v674_v60  ;;  %v719_v20 = vadd.f32 %v706_v6, %v695_v36 }
 0x337   :  { %729 = vst.msk [vmem:[%s1585_s8 + $0x28] sm:$0xff] %vm723_vm13, %v712_v37  ;;  %736 = vst.msk [vmem:[%s1585_s8 + $0x60] sm:$0xff] %vm723_vm13, %v719_v20 }
 0x338   :  { %v698_v40 = vpop.xlane.xlu0 %697  ;;  %v701_v15 = vpop.xlane.xlu1 %700 }
 0x339   :  { %v720_v32 = vadd.f32 %v706_v6, %v698_v40  ;;  %v721_v42 = vadd.f32 %v706_v6, %v701_v15 }
 0x33b   :  { %737 = vst.msk [vmem:[%s1585_s8 + $0x68] sm:$0xff] %vm723_vm13, %v720_v32  ;;  %738 = vst.msk [vmem:[%s1585_s8 + $0x70] sm:$0xff] %vm723_vm13, %v721_v42 }
 0x33c   :  { %v704_v44 = vpop.xlane.xlu0 %703 }
 0x33d   :  { %v722_v34 = vadd.f32 %v706_v6, %v704_v44 }
 0x33f   :  { %739 = vst.msk [vmem:[%s1585_s8 + $0x78] sm:$0xff] %vm723_vm13, %v722_v34 }

// kernel: gat_evolution_forward.2
= control target key start
LH: loop header
LB: loop body
LE: loop exit
PB: predicated region body
PF: predicated region fallthrough
CT: control target
= control target key end

     0   :  { %11 = vsyncpa [#allocation3], 0  ;;  %s2770_s0 = inlined_call_operand.vmem [shape: bf16[2,128,8], index: 0, kind: input, shape index: {}]   ;;  %s2771_s1 = inlined_call_operand.vmem [shape: f32[2,128], index: 1, kind: input, shape index: {}]   ;;  %s2772_s2 = inlined_call_operand.vmem [shape: f32[128,2], index: 2, kind: input, shape index: {}]   ;;  %s2773_s3 = inlined_call_operand.vmem [shape: f32[2], index: 3, kind: input, shape index: {}]   ;;  %s2774_s4 = inlined_call_operand.vmem [shape: bf16[128,128], index: 4, kind: input, shape index: {}]   ;;  %s2775_s5 = inlined_call_operand.vmem [shape: f32[2,1,8], index: 5, kind: input, shape index: {}]   ;;  %s2776_s6 = inlined_call_operand.vmem [shape: f32[2,128,8], index: 6, kind: output, shape index: {}]  }
   0x1   :  { %s24_s23 = sshll.u32 %s2773_s3, 4  ;;  %s25_s23 = int_to_ptr.vmem [resolvable:$true] %s24_s23 }
   0x2   :  { %s1771_s24 = scalar_lea.vmem %s25_s23, 16  ;;  %p1776_p1 = scmp.lt.s32.totalorder %s25_s23, %s25_s23 }
   0x3   :  { %p1772_p0 = scmp.ne.s32.totalorder %s25_s23, %s1771_s24  ;;  %p1777_p2 = scmp.lt.s32.totalorder %s1771_s24, %s1771_s24 }
   0x5   :  { %p1778_p3 = por %p1777_p2, %p1776_p1 }
   0x7   :  { %p1779_p4 = pnand %p1778_p3, %p1772_p0 }
   0x9   :  { %1782 = shalt.err (!%p1779_p4)
}
   0xa   :  { %s1785_s25 = smov [#allocation2]  }
   0xb   :  { %27 = dma.vmem_to_smem %s25_s23, 16, %s1785_s25, [#allocation3]  }
   0xc   :  { %1783 = dma.done.wait [#allocation3], 16  }
   0xd   :  { %1784 = vsyncadd [#allocation3], 4294967280 }
   0xe   :  { %35 = sfence }
   0xf   :  { %v118_v0 = vld [vmem:[%s2772_s2] sm:$0xff]  ;;  %v1786_v1 = vmov 1   ;;  %v1787_v2 = vmov 0   ;;  %v119_v3 = vld [vmem:[%s2772_s2 + $0x8] sm:$0xff]  ;;  %v120_v4 = vld [vmem:[%s2772_s2 + $0x10] sm:$0xff]  ;;  %v214_v19 = vlaneseq  ;;  %s234_s10 = sld [smem:[#allocation2]] }
  0x10   :  { %1547 = vset.pattern.permute.xlu1 %v1786_v1  ;;  %1546 = vset.pattern.permute.xlu0 %v1787_v2  ;;  %v121_v5 = vld [vmem:[%s2772_s2 + $0x18] sm:$0xff]  ;;  %v123_v6 = vld [vmem:[%s2772_s2 + $0x28] sm:$0xff]  ;;  %v124_v7 = vld [vmem:[%s2772_s2 + $0x30] sm:$0xff]  ;;  %s1348_s11 = sld [smem:[#allocation2 + $0x1]]  ;;  %vm1788_vm1 = vmmov 1  }
  0x11   :  { %734 = vperm.xlu1 %1547, %v118_v0   ;;  %136 = vperm.xlu0 %1546, %v118_v0   ;;  %v122_v8 = vld [vmem:[%s2772_s2 + $0x20] sm:$0xff]  ;;  %v127_v9 = vld [vmem:[%s2772_s2 + $0x48] sm:$0xff]  ;;  %v128_v10 = vld [vmem:[%s2772_s2 + $0x50] sm:$0xff]  ;;  %v215_v21 = vshrl.u32 %v214_v19, 7 }
  0x12   :  { %v131_v11 = vld [vmem:[%s2772_s2 + $0x68] sm:$0xff]  ;;  %v132_v12 = vld [vmem:[%s2772_s2 + $0x70] sm:$0xff]  ;;  %v125_v13 = vld [vmem:[%s2772_s2 + $0x38] sm:$0xff] }
  0x13   :  { %v126_v14 = vld [vmem:[%s2772_s2 + $0x40] sm:$0xff]  ;;  %v129_v15 = vld [vmem:[%s2772_s2 + $0x58] sm:$0xff]  ;;  %v1439_v23 = vld [vmem:[%s2774_s4 + $0x8] sm:$0xff]   ;;  %v799_v24 = vsub.s32 1, %v215_v21  ;;  %v216_v25 = vsub.s32 0, %v215_v21 }
  0x14   :  { %v130_v16 = vld [vmem:[%s2772_s2 + $0x60] sm:$0xff]  ;;  %v133_v17 = vld [vmem:[%s2772_s2 + $0x78] sm:$0xff]  ;;  %v1413_v28 = vunpack.c.l.bf16 %v1439_v23  ;;  %v1414_v29 = vunpack.c.h.bf16 %v1439_v23  ;;  %v1901_v30 = vld [vmem:[%s2774_s4 + $0x10] sm:$0xff]  }
  0x15   :  { %738 = vperm.xlu1 %1547, %v119_v3   ;;  %141 = vperm.xlu0 %1546, %v119_v3   ;;  %v1408_v18 = vld [vmem:[%s2774_s4] sm:$0xff]   ;;  %v1903_v31 = vstv %s234_s10  ;;  %v1418_v37 = vunpack.c.h.bf16 %v1901_v30  ;;  %v1441_v35 = vld [vmem:[%s2774_s4 + $0x18] sm:$0xff]  }
  0x16   :  { %v1409_v20 = vunpack.c.l.bf16 %v1408_v18  ;;  %v1410_v22 = vunpack.c.h.bf16 %v1408_v18  ;;  %v117_v27 = vld [vmem:[%s2771_s1] sm:$0x3]  ;;  %v1916_v36 = vstv %s1348_s11  ;;  %vm71_vm5 = vcmp.ne.f32.partialorder %v1413_v28, %v1413_v28 }
  0x17   :  { %v1907_v33 = vrot.slane %v117_v27, %v799_v24  ;;  %v1909_v34 = vrot.slane %v117_v27, %v216_v25  ;;  %vm72_vm6 = vcmp.ne.f32.partialorder %v1414_v29, %v1414_v29  ;;  %vm1926_vm7 = vmxor %vm71_vm5, %vm1788_vm1  ;;  %vm74_vm9 = vcmp.ne.f32.partialorder %v1418_v37, %v1418_v37  ;;  %v1442_v26 = vld [vmem:[%s2774_s4 + $0x20] sm:$0xff]  }
  0x18   :  { %vm69_vm0 = vcmp.ne.f32.partialorder %v1409_v20, %v1409_v20  ;;  %vm70_vm3 = vcmp.ne.f32.partialorder %v1410_v22, %v1410_v22  ;;  %vm1931_vm8 = vmxor %vm72_vm6, %vm1788_vm1  ;;  %v1939_v52 = vsel %vm1926_vm7, %v1413_v28, 0.0 }
  0x19   :  { %1548 = vset.pattern.permute.xlu1 %v1787_v2  ;;  %146 = vperm.xlu0 %1546, %v120_v4   ;;  %vm1891_vm2 = vmxor %vm69_vm0, %vm1788_vm1  ;;  %v104_v56 = vsel %vm1931_vm8, %v1414_v29, 0.0  ;;  %v238_v60 = vmul.f32 %v1903_v31, %v1939_v52 }
  0x1a   :  { %151 = vperm.xlu1 %1548, %v121_v5   ;;  %v101_v32 = vsel %vm1891_vm2, %v1409_v20, 0.0  ;;  %vm1912_vm4 = vmxor %vm70_vm3, %vm1788_vm1  ;;  %v239_v0 = vmul.f32 %v1903_v31, %v104_v56 }
  0x1b   :  { %v236_v38 = vmul.f32 %v1903_v31, %v101_v32  ;;  %v102_v41 = vsel %vm1912_vm4, %v1410_v22, 0.0  ;;  %v819_v42 = vmul.f32 %v1916_v36, %v101_v32  ;;  %vm1946_vm10 = vmxor %vm74_vm9, %vm1788_vm1 }
  0x1c   :  { %v237_v48 = vmul.f32 %v1903_v31, %v102_v41  ;;  %v820_v49 = vmul.f32 %v1916_v36, %v102_v41  ;;  %v1422_v41 = vunpack.c.h.bf16 %v1441_v35 }
  0x1d   :  { %161 = vperm.xlu0 %1546, %v123_v6  }
  0x1e   :  { %1549 = vset.pattern.permute.xlu1 %v1786_v1  ;;  %vm76_vm11 = vcmp.ne.f32.partialorder %v1422_v41, %v1422_v41 }
  0x1f   :  { %746 = vperm.xlu1 %1549, %v121_v5   ;;  %vm2008_vm14 = vmxor %vm76_vm11, %vm1788_vm1 }
  0x21   :  { %166 = vperm.xlu0 %1546, %v124_v7  }
  0x23   :  { %1550 = vset.pattern.permute.xlu1 %v1787_v2 }
  0x24   :  { %156 = vperm.xlu1 %1550, %v122_v8  }
  0x25   :  { %181 = vperm.xlu0 %1546, %v127_v9  }
  0x28   :  { %1551 = vset.pattern.permute.xlu1 %v1786_v1 }
  0x29   :  { %750 = vperm.xlu1 %1551, %v122_v8   ;;  %186 = vperm.xlu0 %1546, %v128_v10  }
  0x2d   :  { %754 = vperm.xlu1 %1551, %v123_v6   ;;  %201 = vperm.xlu0 %1546, %v131_v11  }
  0x31   :  { %1552 = vset.pattern.permute.xlu1 %v1787_v2  ;;  %206 = vperm.xlu0 %1546, %v132_v12  }
  0x32   :  { %171 = vperm.xlu1 %1552, %v125_v13  }
  0x35   :  { %1560 = vset.pattern.permute.xlu0 %v1786_v1 }
  0x36   :  { %1553 = vset.pattern.permute.xlu1 %v1786_v1  ;;  %742 = vperm.xlu0 %1560, %v120_v4  }
  0x37   :  { %762 = vperm.xlu1 %1553, %v125_v13  }
  0x3a   :  { %758 = vperm.xlu0 %1560, %v124_v7  }
  0x3b   :  { %1554 = vset.pattern.permute.xlu1 %v1787_v2 }
  0x3c   :  { %176 = vperm.xlu1 %1554, %v126_v14  }
  0x3e   :  { %774 = vperm.xlu0 %1560, %v128_v10  }
  0x40   :  { %1555 = vset.pattern.permute.xlu1 %v1786_v1 }
  0x41   :  { %766 = vperm.xlu1 %1555, %v126_v14  }
  0x42   :  { %790 = vperm.xlu0 %1560, %v132_v12  }
  0x45   :  { %770 = vperm.xlu1 %1555, %v127_v9  }
  0x49   :  { %1556 = vset.pattern.permute.xlu1 %v1787_v2 }
  0x4a   :  { %191 = vperm.xlu1 %1556, %v129_v15  }
  0x4e   :  { %1557 = vset.pattern.permute.xlu1 %v1786_v1 }
  0x4f   :  { %778 = vperm.xlu1 %1557, %v129_v15   ;;  %v822_v15 = vmul.f32 %v1916_v36, %v104_v56 }
  0x53   :  { %1558 = vset.pattern.permute.xlu1 %v1787_v2 }
  0x54   :  { %196 = vperm.xlu1 %1558, %v130_v16  }
  0x58   :  { %1559 = vset.pattern.permute.xlu1 %v1786_v1 }
  0x59   :  { %782 = vperm.xlu1 %1559, %v130_v16  }
  0x5d   :  { %786 = vperm.xlu1 %1559, %v131_v11  }
  0x61   :  { %1561 = vset.pattern.permute.xlu1 %v1787_v2 }
  0x62   :  { %211 = vperm.xlu1 %1561, %v133_v17  }
  0x66   :  { %1562 = vset.pattern.permute.xlu1 %v1786_v1  ;;  %v106_v1 = vsel %vm1946_vm10, %v1418_v37, 0.0 }
  0x67   :  { %794 = vperm.xlu1 %1562, %v133_v17   ;;  %v241_v10 = vmul.f32 %v1903_v31, %v106_v1 }
  0x8c   :  { %v735_v39 = vpop.permute.xlu1 %734  ;;  %v137_v40 = vpop.permute.xlu0 %136 }
  0x8d   :  { %v801_v43 = vadd.f32 %v1907_v33, %v735_v39  ;;  %v218_v44 = vadd.f32 %v1909_v34, %v137_v40 }
  0x8f   :  { %v252_v47 = vadd.f32 %v236_v38, %v218_v44  ;;  %v835_v53 = vadd.f32 %v819_v42, %v801_v43  ;;  %v1417_v43 = vunpack.c.l.bf16 %v1901_v30 }
  0x90   :  { %v739_v50 = vpop.permute.xlu1 %738  ;;  %v142_v51 = vpop.permute.xlu0 %141 }
  0x91   :  { %v802_v54 = vadd.f32 %v1907_v33, %v739_v50  ;;  %v219_v55 = vadd.f32 %v1909_v34, %v142_v51  ;;  %v268_v57 = vmul.f32 0.2, %v252_v47  ;;  %v851_v2 = vmul.f32 0.2, %v835_v53 }
  0x92   :  { %vm73_vm12 = vcmp.ne.f32.partialorder %v1417_v43, %v1417_v43 }
  0x93   :  { %v253_v59 = vadd.f32 %v237_v48, %v219_v55  ;;  %v284_v61 = vmax.f32 %v252_v47, %v268_v57  ;;  %v836_v62 = vadd.f32 %v820_v49, %v802_v54  ;;  %v867_v16 = vmax.f32 %v835_v53, %v851_v2  ;;  %vm2018_vm15 = vmxor %vm73_vm12, %vm1788_vm1 }
  0x94   :  { %v147_v63 = vpop.permute.xlu0 %146  ;;  %v1426_v48 = vunpack.c.h.bf16 %v1442_v26  ;;  %v1421_v54 = vunpack.c.l.bf16 %v1441_v35  ;;  %v824_v55 = vmul.f32 %v1916_v36, %v106_v1 }
  0x95   :  { %v220_v3 = vadd.f32 %v1909_v34, %v147_v63  ;;  %v152_v4 = vpop.permute.xlu1 %151  ;;  %v1958_v5 = vsel %vm1891_vm2, %v284_v61, -1e+30  ;;  %v269_v6 = vmul.f32 0.2, %v253_v59  ;;  %v852_v7 = vmul.f32 0.2, %v836_v62 }
  0x96   :  { %v221_v8 = vadd.f32 %v1909_v34, %v152_v4  ;;  %316 = vmax.xlane.f32.xlu1 %v1958_v5  ;;  %v1980_v29 = vsel %vm1891_vm2, %v867_v16, -1e+30  ;;  %vm78_vm13 = vcmp.ne.f32.partialorder %v1426_v48, %v1426_v48  ;;  %vm75_vm2 = vcmp.ne.f32.partialorder %v1421_v54, %v1421_v54 }
  0x97   :  { %v254_v9 = vadd.f32 %v238_v60, %v220_v3  ;;  %v285_v11 = vmax.f32 %v253_v59, %v269_v6  ;;  %v868_v12 = vmax.f32 %v836_v62, %v852_v7  ;;  %vm2026_vm0 = vmxor %vm78_vm13, %vm1788_vm1  ;;  %v108_v62 = vsel %vm2008_vm14, %v1422_v41, 0.0 }
  0x98   :  { %v255_v13 = vadd.f32 %v239_v0, %v221_v8  ;;  %v162_v14 = vpop.permute.xlu0 %161  ;;  %v105_v63 = vsel %vm2018_vm15, %v1417_v43, 0.0  ;;  %v2037_v1 = vsel %vm2026_vm0, %v1426_v48, 0.0  ;;  %v243_v3 = vmul.f32 %v1903_v31, %v108_v62  ;;  %vm2043_vm3 = vmxor %vm75_vm2, %vm1788_vm1  ;;  %v1444_v43 = vld [vmem:[%s2774_s4 + $0x30] sm:$0xff]  }
  0x99   :  { %v223_v17 = vadd.f32 %v1909_v34, %v162_v14  ;;  %v1967_v18 = vsel %vm1912_vm4, %v285_v11, -1e+30  ;;  %v1971_v19 = vsel %vm1912_vm4, %v868_v12, -1e+30  ;;  %v270_v20 = vmul.f32 0.2, %v254_v9 }
  0x9a   :  { %v747_v21 = vpop.permute.xlu1 %746  ;;  %318 = vmax.xlane.f32.xlu0 %v1967_v18  ;;  %901 = vmax.xlane.f32.xlu1 %v1971_v19  ;;  %v271_v22 = vmul.f32 0.2, %v255_v13  ;;  %v245_v12 = vmul.f32 %v1903_v31, %v2037_v1  ;;  %v1425_v14 = vunpack.c.l.bf16 %v1442_v26  ;;  %v821_v16 = vmul.f32 %v1916_v36, %v1939_v52 }
  0x9b   :  { %v257_v23 = vadd.f32 %v241_v10, %v223_v17  ;;  %v804_v24 = vadd.f32 %v1907_v33, %v747_v21  ;;  %v286_v32 = vmax.f32 %v254_v9, %v270_v20  ;;  %v240_v9 = vmul.f32 %v1903_v31, %v105_v63  ;;  %v1443_v21 = vld [vmem:[%s2774_s4 + $0x28] sm:$0xff]  }
  0x9c   :  { %v1976_v25 = vpop.permute.xlu0 %166  ;;  %v287_v27 = vmax.f32 %v255_v13, %v271_v22  ;;  %v107_v17 = vsel %vm2043_vm3, %v1421_v54, 0.0  ;;  %v823_v20 = vmul.f32 %v1916_v36, %v105_v63  ;;  %vm77_vm4 = vcmp.ne.f32.partialorder %v1425_v14, %v1425_v14 }
  0x9d   :  { %v838_v28 = vadd.f32 %v822_v15, %v804_v24  ;;  %v273_v40 = vmul.f32 0.2, %v257_v23  ;;  %v1997_v44 = vsel %vm1926_vm7, %v286_v32, -1e+30  ;;  %v224_v58 = vadd.f32 %v1909_v34, %v1976_v25  ;;  %vm2077_vm5 = vmxor %vm77_vm4, %vm1788_vm1 }
  0x9e   :  { %899 = vmax.xlane.f32.xlu0 %v1980_v29  ;;  %v1988_v37 = vsel %vm1931_vm8, %v287_v27, -1e+30  ;;  %v1430_v63 = vunpack.c.h.bf16 %v1443_v21 }
  0x9f   :  { %v157_v38 = vpop.permute.xlu1 %156  ;;  %322 = vmax.xlane.f32.xlu1 %v1988_v37  ;;  %v854_v39 = vmul.f32 0.2, %v838_v28  ;;  %v289_v50 = vmax.f32 %v257_v23, %v273_v40  ;;  %v826_v23 = vmul.f32 %v1916_v36, %v108_v62 }
  0xa0   :  { %v182_v42 = vpop.permute.xlu0 %181  ;;  %v222_v8 = vadd.f32 %v1909_v34, %v157_v38 }
  0xa1   :  { %v870_v47 = vmax.f32 %v838_v28, %v854_v39  ;;  %v2015_v46 = vsel %vm1946_vm10, %v289_v50, -1e+30  ;;  %v227_v11 = vadd.f32 %v1909_v34, %v182_v42  ;;  %v1429_v39 = vunpack.c.l.bf16 %v1443_v21 }
  0xa2   :  { %320 = vmax.xlane.f32.xlu0 %v1997_v44  ;;  %v256_v27 = vadd.f32 %v240_v9, %v222_v8  ;;  %v242_v42 = vmul.f32 %v1903_v31, %v107_v17  ;;  %v109_v8 = vsel %vm2077_vm5, %v1425_v14, 0.0 }
  0xa3   :  { %v2002_v49 = vsel %vm1931_vm8, %v870_v47, -1e+30  ;;  %v261_v38 = vadd.f32 %v245_v12, %v227_v11  ;;  %vm79_vm6 = vcmp.ne.f32.partialorder %v1429_v39, %v1429_v39  ;;  %vm80_vm8 = vcmp.ne.f32.partialorder %v1430_v63, %v1430_v63 }
  0xa4   :  { %v751_v51 = vpop.permute.xlu1 %750  ;;  %v2004_v53 = vpop.permute.xlu0 %186  ;;  %905 = vmax.xlane.f32.xlu1 %v2002_v49  ;;  %vm2102_vm9 = vmxor %vm79_vm6, %vm1788_vm1  ;;  %v244_v45 = vmul.f32 %v1903_v31, %v109_v8 }
  0xa5   :  { %v805_v28 = vadd.f32 %v1907_v33, %v751_v51  ;;  %v277_v62 = vmul.f32 0.2, %v261_v38  ;;  %v228_v56 = vadd.f32 %v1909_v34, %v2004_v53 }
  0xa7   :  { %v839_v48 = vadd.f32 %v823_v20, %v805_v28  ;;  %v828_v28 = vmul.f32 %v1916_v36, %v2037_v1 }
  0xa8   :  { %v755_v57 = vpop.permute.xlu1 %754  ;;  %v2022_v59 = vpop.permute.xlu0 %201  ;;  %326 = vmax.xlane.f32.xlu1 %v2015_v46 }
  0xa9   :  { %v806_v61 = vadd.f32 %v1907_v33, %v755_v57  ;;  %v231_v53 = vadd.f32 %v1909_v34, %v2022_v59 }
  0xab   :  { %v840_v0 = vadd.f32 %v824_v55, %v806_v61  ;;  %v272_v55 = vmul.f32 0.2, %v256_v27 }
  0xac   :  { %v2039_v2 = vpop.permute.xlu0 %206 }
  0xad   :  { %v172_v4 = vpop.permute.xlu1 %171  ;;  %v856_v6 = vmul.f32 0.2, %v840_v0  ;;  %v288_v12 = vmax.f32 %v256_v27, %v272_v55  ;;  %v1445_v55 = vld [vmem:[%s2774_s4 + $0x38] sm:$0xff]   ;;  %v232_v50 = vadd.f32 %v1909_v34, %v2039_v2 }
  0xae   :  { %v225_v10 = vadd.f32 %v1909_v34, %v172_v4  ;;  %v258_v4 = vadd.f32 %v242_v42, %v224_v58 }
  0xaf   :  { %v872_v13 = vmax.f32 %v840_v0, %v856_v6  ;;  %v1434_v0 = vunpack.c.h.bf16 %v1444_v43  ;;  %v825_v6 = vmul.f32 %v1916_v36, %v107_v17 }
  0xb0   :  { %v259_v15 = vadd.f32 %v243_v3, %v225_v10  ;;  %v274_v20 = vmul.f32 0.2, %v258_v4 }
  0xb1   :  { %v743_v22 = vpop.permute.xlu0 %742  ;;  %v2064_v24 = vsel %vm1946_vm10, %v872_v13, -1e+30  ;;  %v855_v13 = vmul.f32 0.2, %v839_v48  ;;  %vm2113_vm10 = vmxor %vm80_vm8, %vm1788_vm1 }
  0xb2   :  { %v803_v52 = vadd.f32 %v1907_v33, %v743_v22  ;;  %v763_v32 = vpop.permute.xlu1 %762  ;;  %909 = vmax.xlane.f32.xlu1 %v2064_v24  ;;  %v275_v35 = vmul.f32 0.2, %v259_v15  ;;  %v2110_v22 = vsel %vm2018_vm15, %v288_v12, -1e+30  ;;  %v290_v58 = vmax.f32 %v258_v4, %v274_v20 }
  0xb3   :  { %v808_v26 = vadd.f32 %v1907_v33, %v763_v32  ;;  %v1433_v32 = vunpack.c.l.bf16 %v1444_v43  ;;  %v1437_v12 = vunpack.c.l.bf16 %v1445_v55 }
  0xb4   :  { %v837_v40 = vadd.f32 %v821_v16, %v803_v52  ;;  %v291_v41 = vmax.f32 %v259_v15, %v275_v35  ;;  %v293_v16 = vmax.f32 %v261_v38, %v277_v62  ;;  %v111_v35 = vsel %vm2102_vm9, %v1429_v39, 0.0 }
  0xb5   :  { %v842_v47 = vadd.f32 %v826_v23, %v808_v26  ;;  %v759_v25 = vpop.permute.xlu0 %758  ;;  %v871_v23 = vmax.f32 %v839_v48, %v855_v13  ;;  %vm81_vm12 = vcmp.ne.f32.partialorder %v1433_v32, %v1433_v32  ;;  %v2156_v62 = vsel %vm2043_vm3, %v290_v58, -1e+30 }
  0xb6   :  { %v2083_v51 = vsel %vm2008_vm14, %v291_v41, -1e+30  ;;  %v853_v54 = vmul.f32 0.2, %v837_v40  ;;  %v807_v10 = vadd.f32 %v1907_v33, %v759_v25  ;;  %v2122_v52 = vsel %vm2026_vm0, %v293_v16, -1e+30  ;;  %vm2160_vm13 = vmxor %vm81_vm12, %vm1788_vm1 }
  0xb7   :  { %v177_v57 = vpop.permute.xlu1 %176  ;;  %330 = vmax.xlane.f32.xlu1 %v2083_v51  ;;  %v858_v61 = vmul.f32 0.2, %v842_v47  ;;  %v112_v41 = vsel %vm2113_vm10, %v1430_v63, 0.0  ;;  %v2140_v43 = vsel %vm2018_vm15, %v871_v23, -1e+30  ;;  %v829_v16 = vmul.f32 %v1916_v36, %v111_v35 }
  0xb8   :  { %v869_v3 = vmax.f32 %v837_v40, %v853_v54  ;;  %v841_v21 = vadd.f32 %v825_v6, %v807_v10  ;;  %v226_v30 = vadd.f32 %v1909_v34, %v177_v57  ;;  %v827_v40 = vmul.f32 %v1916_v36, %v109_v8 }
  0xb9   :  { %v874_v9 = vmax.f32 %v842_v47, %v858_v61  ;;  %v247_v25 = vmul.f32 %v1903_v31, %v112_v41  ;;  %v246_v57 = vmul.f32 %v1903_v31, %v111_v35  ;;  %v113_v59 = vsel %vm2160_vm13, %v1433_v32, 0.0 }
  0xba   :  { %v2092_v11 = vsel %vm1926_vm7, %v869_v3, -1e+30  ;;  %vm82_vm7 = vcmp.ne.f32.partialorder %v1434_v0, %v1434_v0  ;;  %v260_v42 = vadd.f32 %v244_v45, %v226_v30  ;;  %v857_v47 = vmul.f32 0.2, %v841_v21  ;;  %v775_v3 = vpop.permute.xlu0 %774 }
  0xbb   :  { %903 = vmax.xlane.f32.xlu0 %v2092_v11  ;;  %v2097_v15 = vsel %vm2008_vm14, %v874_v9, -1e+30  ;;  %vm2129_vm11 = vmxor %vm82_vm7, %vm1788_vm1  ;;  %v830_v45 = vmul.f32 %v1916_v36, %v112_v41  ;;  %v262_v20 = vadd.f32 %v246_v57, %v228_v56  ;;  %vm83_vm14 = vcmp.ne.f32.partialorder %v1437_v12, %v1437_v12 }
  0xbc   :  { %v767_v17 = vpop.permute.xlu1 %766  ;;  %913 = vmax.xlane.f32.xlu1 %v2097_v15  ;;  %v2145_v54 = vsel %vm2129_vm11, %v1434_v0, 0.0  ;;  %v873_v6 = vmax.f32 %v841_v21, %v857_v47  ;;  %v276_v9 = vmul.f32 0.2, %v260_v42  ;;  %v811_v21 = vadd.f32 %v1907_v33, %v775_v3  ;;  %vm2187_vm15 = vmxor %vm83_vm14, %vm1788_vm1 }
  0xbd   :  { %v809_v39 = vadd.f32 %v1907_v33, %v767_v17  ;;  %v249_v10 = vmul.f32 %v1903_v31, %v2145_v54  ;;  %v248_v32 = vmul.f32 %v1903_v31, %v113_v59  ;;  %v832_v2 = vmul.f32 %v1916_v36, %v2145_v54 }
  0xbe   :  { %v292_v35 = vmax.f32 %v260_v42, %v276_v9  ;;  %v845_v7 = vadd.f32 %v829_v16, %v811_v21 }
  0xbf   :  { %324 = vmax.xlane.f32.xlu0 %v2110_v22  ;;  %v843_v0 = vadd.f32 %v827_v40, %v809_v39  ;;  %v278_v39 = vmul.f32 0.2, %v262_v20 }
  0xc0   :  { %v771_v38 = vpop.permute.xlu1 %770  ;;  %334 = vmax.xlane.f32.xlu1 %v2122_v52  ;;  %v2193_v42 = vsel %vm2077_vm5, %v292_v35, -1e+30 }
  0xc1   :  { %v810_v1 = vadd.f32 %v1907_v33, %v771_v38  ;;  %v859_v40 = vmul.f32 0.2, %v843_v0 }
  0xc3   :  { %v844_v48 = vadd.f32 %v828_v28, %v810_v1  ;;  %907 = vmax.xlane.f32.xlu0 %v2140_v43  ;;  %v2181_v28 = vsel %vm2043_vm3, %v873_v6, -1e+30  ;;  %v265_v1 = vadd.f32 %v249_v10, %v231_v53  ;;  %v861_v10 = vmul.f32 0.2, %v845_v7 }
  0xc5   :  { %v192_v61 = vpop.permute.xlu1 %191  ;;  %v860_v63 = vmul.f32 0.2, %v844_v48  ;;  %v877_v21 = vmax.f32 %v845_v7, %v861_v10 }
  0xc6   :  { %v229_v4 = vadd.f32 %v1909_v34, %v192_v61  ;;  %v281_v61 = vmul.f32 0.2, %v265_v1 }
  0xc7   :  { %328 = vmax.xlane.f32.xlu0 %v2156_v62  ;;  %v876_v13 = vmax.f32 %v844_v48, %v860_v63  ;;  %v1438_v63 = vunpack.c.h.bf16 %v1445_v55  ;;  %v2243_v54 = vsel %vm2102_vm9, %v877_v21, -1e+30 }
  0xc8   :  { %v263_v17 = vadd.f32 %v247_v25, %v229_v4  ;;  %v875_v25 = vmax.f32 %v843_v0, %v859_v40  ;;  %v115_v4 = vsel %vm2187_vm15, %v1437_v12, 0.0  ;;  %v294_v0 = vmax.f32 %v262_v20, %v278_v39 }
  0xc9   :  { %v2174_v30 = vsel %vm2026_vm0, %v876_v13, -1e+30  ;;  %v831_v13 = vmul.f32 %v1916_v36, %v113_v59  ;;  %v297_v16 = vmax.f32 %v265_v1, %v281_v61  ;;  %vm84_vm0 = vcmp.ne.f32.partialorder %v1438_v63, %v1438_v63 }
  0xca   :  { %v779_v23 = vpop.permute.xlu1 %778  ;;  %917 = vmax.xlane.f32.xlu1 %v2174_v30  ;;  %v279_v38 = vmul.f32 0.2, %v263_v17  ;;  %v2206_v53 = vsel %vm2077_vm5, %v875_v25, -1e+30  ;;  %v250_v12 = vmul.f32 %v1903_v31, %v115_v4  ;;  %v2221_v20 = vsel %vm2102_vm9, %v294_v0, -1e+30  ;;  %vm2224_vm2 = vmxor %vm84_vm0, %vm1788_vm1 }
  0xcb   :  { %v812_v41 = vadd.f32 %v1907_v33, %v779_v23  ;;  %911 = vmax.xlane.f32.xlu0 %v2181_v28  ;;  %v791_v23 = vpop.permute.xlu0 %790  ;;  %vm716_vm1 = vcmask 64512  }
  0xcc   :  { %v295_v60 = vmax.f32 %v263_v17, %v279_v38  ;;  %v2233_v38 = vsel %vm2129_vm11, %v297_v16, -1e+30  ;;  %v266_v1 = vadd.f32 %v250_v12, %v232_v50 }
  0xcd   :  { %v846_v58 = vadd.f32 %v830_v45, %v812_v41  ;;  %v833_v41 = vmul.f32 %v1916_v36, %v115_v4 }
  0xce   :  { %v2197_v48 = vsel %vm2113_vm10, %v295_v60, -1e+30 }
  0xcf   :  { %v197_v56 = vpop.permute.xlu1 %196  ;;  %332 = vmax.xlane.f32.xlu0 %v2193_v42  ;;  %338 = vmax.xlane.f32.xlu1 %v2197_v48  ;;  %v862_v57 = vmul.f32 0.2, %v846_v58 }
  0xd0   :  { %v230_v3 = vadd.f32 %v1909_v34, %v197_v56 }
  0xd1   :  { %v878_v6 = vmax.f32 %v846_v58, %v862_v57  ;;  %v116_v58 = vsel %vm2224_vm2, %v1438_v63, 0.0 }
  0xd2   :  { %v264_v9 = vadd.f32 %v248_v32, %v230_v3  ;;  %v815_v32 = vadd.f32 %v1907_v33, %v791_v23  ;;  %v251_v56 = vmul.f32 %v1903_v31, %v116_v58  ;;  %v282_v3 = vmul.f32 0.2, %v266_v1 }
  0xd3   :  { %915 = vmax.xlane.f32.xlu0 %v2206_v53  ;;  %v2212_v55 = vsel %vm2113_vm10, %v878_v6, -1e+30  ;;  %v834_v10 = vmul.f32 %v1916_v36, %v116_v58 }
  0xd4   :  { %v783_v17 = vpop.permute.xlu1 %782  ;;  %921 = vmax.xlane.f32.xlu1 %v2212_v55  ;;  %v280_v59 = vmul.f32 0.2, %v264_v9  ;;  %v849_v4 = vadd.f32 %v833_v41, %v815_v32  ;;  %v298_v16 = vmax.f32 %v266_v1, %v282_v3 }
  0xd5   :  { %v813_v45 = vadd.f32 %v1907_v33, %v783_v17 }
  0xd6   :  { %v296_v39 = vmax.f32 %v264_v9, %v280_v59  ;;  %v865_v50 = vmul.f32 0.2, %v849_v4  ;;  %v2267_v26 = vsel %vm2187_vm15, %v298_v16, -1e+30 }
  0xd7   :  { %v847_v35 = vadd.f32 %v831_v13, %v813_v45  ;;  %336 = vmax.xlane.f32.xlu0 %v2221_v20 }
  0xd8   :  { %v787_v40 = vpop.permute.xlu1 %786  ;;  %342 = vmax.xlane.f32.xlu1 %v2233_v38  ;;  %v2250_v63 = vsel %vm2160_vm13, %v296_v39, -1e+30  ;;  %v881_v8 = vmax.f32 %v849_v4, %v865_v50 }
  0xd9   :  { %v814_v60 = vadd.f32 %v1907_v33, %v787_v40  ;;  %v863_v7 = vmul.f32 0.2, %v847_v35 }
  0xdb   :  { %v848_v25 = vadd.f32 %v832_v2, %v814_v60  ;;  %919 = vmax.xlane.f32.xlu0 %v2243_v54  ;;  %v879_v14 = vmax.f32 %v847_v35, %v863_v7  ;;  %v1563_v2 = vld [vmem:[%s2770_s0 + $0x38] sm:$0xff]  }
  0xdc   :  { %1478 = vmatprep.subr.bf16.mxu0 %v1563_v2 }
  0xdd   :  { %v212_v57 = vpop.permute.xlu1 %211  ;;  %v864_v61 = vmul.f32 0.2, %v848_v25  ;;  %1479 = vmatpush3.bf16.msra.mxu0 %v1563_v2 }
  0xde   :  { %v233_v6 = vadd.f32 %v1909_v34, %v212_v57  ;;  %v2261_v34 = vsel %vm2160_vm13, %v879_v14, -1e+30 }
  0xdf   :  { %340 = vmax.xlane.f32.xlu0 %v2250_v63  ;;  %v880_v9 = vmax.f32 %v848_v25, %v864_v61 }
  0xe0   :  { %v267_v0 = vadd.f32 %v251_v56, %v233_v6 }
  0xe1   :  { %v2256_v31 = vsel %vm2129_vm11, %v880_v9, -1e+30 }
  0xe2   :  { %v795_v13 = vpop.permute.xlu1 %794  ;;  %925 = vmax.xlane.f32.xlu1 %v2256_v31  ;;  %v283_v17 = vmul.f32 0.2, %v267_v0 }
  0xe3   :  { %v816_v12 = vadd.f32 %v1907_v33, %v795_v13  ;;  %923 = vmax.xlane.f32.xlu0 %v2261_v34  ;;  %v2277_v33 = vsel %vm2187_vm15, %v881_v8, -1e+30 }
  0xe4   :  { %v299_v45 = vmax.f32 %v267_v0, %v283_v17  ;;  %v1564_v17 = vld [vmem:[%s2770_s0 + $0x30] sm:$0xff]  }
  0xe5   :  { %v850_v36 = vadd.f32 %v834_v10, %v816_v12  ;;  %1480 = vmatprep.subr.bf16.mxu0 %v1564_v17 }
  0xe6   :  { %v2271_v21 = vsel %vm2224_vm2, %v299_v45, -1e+30  ;;  %1481 = vmatpush3.bf16.msra.mxu0 %v1564_v17 }
  0xe7   :  { %344 = vmax.xlane.f32.xlu0 %v2267_v26  ;;  %346 = vmax.xlane.f32.xlu1 %v2271_v21  ;;  %v866_v59 = vmul.f32 0.2, %v850_v36 }
  0xe9   :  { %v882_v23 = vmax.f32 %v850_v36, %v866_v59  ;;  %v1565_v36 = vld [vmem:[%s2770_s0 + $0x28] sm:$0xff]  }
  0xea   :  { %1482 = vmatprep.subr.bf16.mxu0 %v1565_v36 }
  0xeb   :  { %927 = vmax.xlane.f32.xlu0 %v2277_v33  ;;  %v2282_v35 = vsel %vm2224_vm2, %v882_v23, -1e+30  ;;  %1483 = vmatpush3.bf16.msra.mxu0 %v1565_v36 }
  0xec   :  { %929 = vmax.xlane.f32.xlu1 %v2282_v35 }
 0x11f   :  { %v317_v40 = vpop.xlane.xlu1 %316 }
 0x120   :  { %v348_v1 = vsub.f32 %v1958_v5, %v317_v40 }
 0x122   :  { %v364_v47 = vmul.f32 1.442695, %v348_v1 }
 0x123   :  { %v319_v41 = vpop.xlane.xlu0 %318  ;;  %v902_v60 = vpop.xlane.xlu1 %901 }
 0x124   :  { %1579 = vpow2.f32 %v364_v47  ;;  %v349_v58 = vsub.f32 %v1967_v18, %v319_v41  ;;  %v932_v27 = vsub.f32 %v1971_v19, %v902_v60  ;;  %v1566_v47 = vld [vmem:[%s2770_s0 + $0x20] sm:$0xff]  }
 0x125   :  { %1484 = vmatprep.subr.bf16.mxu0 %v1566_v47 }
 0x126   :  { %v366_v32 = vmul.f32 1.442695, %v349_v58  ;;  %v949_v39 = vmul.f32 1.442695, %v932_v27  ;;  %1485 = vmatpush3.bf16.msra.mxu0 %v1566_v47  ;;  %v1574_v47 = vld [vmem:[%s2770_s0 + $0x60] sm:$0xff]  }
 0x127   :  { %v900_v7 = vpop.xlane.xlu0 %899 }
 0x128   :  { %1581 = vpow2.f32 %v366_v32  ;;  %v931_v25 = vsub.f32 %v1980_v29, %v900_v7  ;;  %v323_v56 = vpop.xlane.xlu1 %322 }
 0x129   :  { %v351_v57 = vsub.f32 %v1988_v37, %v323_v56  ;;  %1583 = vpow2.f32 %v949_v39  ;;  %v1568_v56 = vld [vmem:[%s2770_s0 + $0x10] sm:$0xff]  }
 0x12a   :  { %v947_v61 = vmul.f32 1.442695, %v931_v25 }
 0x12b   :  { %v370_v5 = vmul.f32 1.442695, %v351_v57  ;;  %v321_v3 = vpop.xlane.xlu0 %320 }
 0x12c   :  { %1585 = vpow2.f32 %v947_v61  ;;  %v350_v4 = vsub.f32 %v1997_v44, %v321_v3 }
 0x12d   :  { %v906_v6 = vpop.xlane.xlu1 %905  ;;  %1587 = vpow2.f32 %v370_v5  ;;  %v1569_v5 = vld [vmem:[%s2770_s0 + $0x8] sm:$0xff]  }
 0x12e   :  { %v368_v18 = vmul.f32 1.442695, %v350_v4  ;;  %v934_v19 = vsub.f32 %v2002_v49, %v906_v6  ;;  %v1571_v6 = vld [vmem:[%s2770_s0] sm:$0xff]  }
 0x130   :  { %1589 = vpow2.f32 %v368_v18  ;;  %v953_v14 = vmul.f32 1.442695, %v934_v19 }
 0x131   :  { %v2295_v9 = vpop.eup %1579  ;;  %v327_v29 = vpop.xlane.xlu1 %326 }
 0x132   :  { %v353_v0 = vsub.f32 %v2015_v46, %v327_v29  ;;  %396 = vadd.xlane.f32.xlu0 %v2295_v9  ;;  %1591 = vpow2.f32 %v953_v14 }
 0x134   :  { %v374_v37 = vmul.f32 1.442695, %v353_v0 }
 0x135   :  { %v2299_v10 = vpop.eup %1581 }
 0x136   :  { %398 = vadd.xlane.f32.xlu1 %v2299_v10  ;;  %v2302_v44 = vpop.eup %1583  ;;  %1593 = vpow2.f32 %v374_v37 }
 0x139   :  { %v2304_v49 = vpop.eup %1585 }
 0x13a   :  { %979 = vadd.xlane.f32.xlu0 %v2304_v49  ;;  %981 = vadd.xlane.f32.xlu1 %v2302_v44  ;;  %v2308_v16 = vpop.eup %1587 }
 0x13b   :  { %v910_v13 = vpop.xlane.xlu1 %909 }
 0x13c   :  { %v936_v46 = vsub.f32 %v2064_v24, %v910_v13  ;;  %v1572_v13 = vld [vmem:[%s2770_s0 + $0x70] sm:$0xff]  }
 0x13d   :  { %v2314_v50 = vpop.eup %1589 }
 0x13e   :  { %v957_v12 = vmul.f32 1.442695, %v936_v46  ;;  %400 = vadd.xlane.f32.xlu0 %v2314_v50  ;;  %402 = vadd.xlane.f32.xlu1 %v2308_v16 }
 0x13f   :  { %v2321_v24 = vpop.eup %1591 }
 0x140   :  { %1595 = vpow2.f32 %v957_v12  ;;  %v331_v45 = vpop.xlane.xlu1 %330 }
 0x141   :  { %v355_v8 = vsub.f32 %v2083_v51, %v331_v45 }
 0x142   :  { %985 = vadd.xlane.f32.xlu1 %v2321_v24 }
 0x143   :  { %v378_v59 = vmul.f32 1.442695, %v355_v8  ;;  %v2325_v2 = vpop.eup %1593  ;;  %v1573_v8 = vld [vmem:[%s2770_s0 + $0x68] sm:$0xff]  }
 0x144   :  { %v904_v23 = vpop.xlane.xlu0 %903 }
 0x145   :  { %1597 = vpow2.f32 %v378_v59  ;;  %v933_v40 = vsub.f32 %v2092_v11, %v904_v23  ;;  %v914_v1 = vpop.xlane.xlu1 %913  ;;  %v1567_v11 = vld [vmem:[%s2770_s0 + $0x18] sm:$0xff]  }
 0x146   :  { %v938_v41 = vsub.f32 %v2097_v15, %v914_v1  ;;  %406 = vadd.xlane.f32.xlu1 %v2325_v2  ;;  %1486 = vmatprep.subr.bf16.mxu0 %v1567_v11 }
 0x147   :  { %v951_v51 = vmul.f32 1.442695, %v933_v40  ;;  %1487 = vmatpush3.bf16.msra.mxu0 %v1567_v11 }
 0x148   :  { %v961_v60 = vmul.f32 1.442695, %v938_v41  ;;  %v325_v58 = vpop.xlane.xlu0 %324  ;;  %1488 = vmatprep.subr.bf16.mxu0 %v1568_v56 }
 0x149   :  { %1599 = vpow2.f32 %v951_v51  ;;  %v352_v27 = vsub.f32 %v2110_v22, %v325_v58  ;;  %v335_v32 = vpop.xlane.xlu1 %334 }
 0x14a   :  { %1601 = vpow2.f32 %v961_v60  ;;  %v357_v39 = vsub.f32 %v2122_v52, %v335_v32 }
 0x14b   :  { %v372_v7 = vmul.f32 1.442695, %v352_v27  ;;  %1489 = vmatpush3.bf16.msra.mxu0 %v1568_v56 }
 0x14c   :  { %v382_v15 = vmul.f32 1.442695, %v357_v39  ;;  %v908_v25 = vpop.xlane.xlu0 %907  ;;  %1490 = vmatprep.subr.bf16.mxu0 %v1569_v5 }
 0x14d   :  { %v2341_v57 = vpop.eup %1595  ;;  %1603 = vpow2.f32 %v372_v7  ;;  %v935_v22 = vsub.f32 %v2140_v43, %v908_v25  ;;  %v1570_v43 = vld [vmem:[%s2770_s0 + $0x78] sm:$0xff]  }
 0x14e   :  { %1605 = vpow2.f32 %v382_v15  ;;  %989 = vadd.xlane.f32.xlu1 %v2341_v57  ;;  %1510 = vmatprep.subr.bf16.mxu1 %v1570_v43 }
 0x14f   :  { %v955_v61 = vmul.f32 1.442695, %v935_v22  ;;  %1491 = vmatpush3.bf16.msra.mxu0 %v1569_v5  ;;  %1511 = vmatpush3.bf16.msra.mxu1 %v1570_v43 }
 0x150   :  { %v329_v52 = vpop.xlane.xlu0 %328  ;;  %1492 = vmatprep.subr.bf16.mxu0 %v1571_v6  ;;  %1512 = vmatprep.subr.bf16.mxu1 %v1572_v13 }
 0x151   :  { %1607 = vpow2.f32 %v955_v61  ;;  %v354_v3 = vsub.f32 %v2156_v62, %v329_v52 }
 0x152   :  { %v2349_v4 = vpop.eup %1597 }
 0x153   :  { %v376_v18 = vmul.f32 1.442695, %v354_v3  ;;  %410 = vadd.xlane.f32.xlu1 %v2349_v4  ;;  %v918_v19 = vpop.xlane.xlu1 %917  ;;  %1493 = vmatpush3.bf16.msra.mxu0 %v1571_v6 }
 0x154   :  { %v940_v14 = vsub.f32 %v2174_v30, %v918_v19  ;;  %v912_v29 = vpop.xlane.xlu0 %911  ;;  %1513 = vmatpush3.bf16.msra.mxu1 %v1572_v13 }
 0x155   :  { %1609 = vpow2.f32 %v376_v18  ;;  %v937_v62 = vsub.f32 %v2181_v28, %v912_v29  ;;  %1514 = vmatprep.subr.bf16.mxu1 %v1573_v8  ;;  %v1578_v29 = vld [vmem:[%s2770_s0 + $0x40] sm:$0xff]  }
 0x156   :  { %v2360_v0 = vpop.eup %1599  ;;  %v965_v37 = vmul.f32 1.442695, %v940_v14 }
 0x157   :  { %v2365_v46 = vpop.eup %1601  ;;  %v959_v17 = vmul.f32 1.442695, %v937_v62  ;;  %983 = vadd.xlane.f32.xlu0 %v2360_v0 }
 0x158   :  { %1611 = vpow2.f32 %v965_v37  ;;  %v333_v30 = vpop.xlane.xlu0 %332  ;;  %993 = vadd.xlane.f32.xlu1 %v2365_v46  ;;  %v339_v12 = vpop.xlane.xlu1 %338  ;;  %1515 = vmatpush3.bf16.msra.mxu1 %v1573_v8 }
 0x159   :  { %1613 = vpow2.f32 %v959_v17  ;;  %v356_v28 = vsub.f32 %v2193_v42, %v333_v30  ;;  %v359_v45 = vsub.f32 %v2197_v48, %v339_v12  ;;  %1516 = vmatprep.subr.bf16.mxu1 %v1574_v47 }
 0x15a   :  { %v2371_v36 = vpop.eup %1603 }
 0x15b   :  { %v2376_v59 = vpop.eup %1605  ;;  %v380_v23 = vmul.f32 1.442695, %v356_v28  ;;  %v386_v40 = vmul.f32 1.442695, %v359_v45  ;;  %404 = vadd.xlane.f32.xlu0 %v2371_v36 }
 0x15c   :  { %v916_v1 = vpop.xlane.xlu0 %915  ;;  %414 = vadd.xlane.f32.xlu1 %v2376_v59  ;;  %1517 = vmatpush3.bf16.msra.mxu1 %v1574_v47 }
 0x15d   :  { %1615 = vpow2.f32 %v380_v23  ;;  %v939_v42 = vsub.f32 %v2206_v53, %v916_v1  ;;  %v922_v48 = vpop.xlane.xlu1 %921 }
 0x15e   :  { %v2384_v41 = vpop.eup %1607  ;;  %1617 = vpow2.f32 %v386_v40  ;;  %v942_v51 = vsub.f32 %v2212_v55, %v922_v48  ;;  %v1575_v55 = vld [vmem:[%s2770_s0 + $0x58] sm:$0xff]  }
 0x15f   :  { %v963_v60 = vmul.f32 1.442695, %v939_v42  ;;  %987 = vadd.xlane.f32.xlu0 %v2384_v41  ;;  %1518 = vmatprep.subr.bf16.mxu1 %v1575_v55 }
 0x160   :  { %v969_v58 = vmul.f32 1.442695, %v942_v51  ;;  %v337_v27 = vpop.xlane.xlu0 %336  ;;  %1519 = vmatpush3.bf16.msra.mxu1 %v1575_v55 }
 0x161   :  { %1619 = vpow2.f32 %v963_v60  ;;  %v358_v53 = vsub.f32 %v2221_v20, %v337_v27  ;;  %v343_v32 = vpop.xlane.xlu1 %342 }
 0x162   :  { %v2389_v11 = vpop.eup %1609  ;;  %1621 = vpow2.f32 %v969_v58  ;;  %v361_v39 = vsub.f32 %v2233_v38, %v343_v32  ;;  %v1576_v38 = vld [vmem:[%s2770_s0 + $0x50] sm:$0xff]  }
 0x163   :  { %v384_v7 = vmul.f32 1.442695, %v358_v53  ;;  %408 = vadd.xlane.f32.xlu0 %v2389_v11  ;;  %1520 = vmatprep.subr.bf16.mxu1 %v1576_v38 }
 0x164   :  { %v390_v15 = vmul.f32 1.442695, %v361_v39  ;;  %v920_v25 = vpop.xlane.xlu0 %919  ;;  %1521 = vmatpush3.bf16.msra.mxu1 %v1576_v38 }
 0x165   :  { %v2396_v56 = vpop.eup %1611  ;;  %1623 = vpow2.f32 %v384_v7  ;;  %v941_v20 = vsub.f32 %v2243_v54, %v920_v25  ;;  %v1577_v54 = vld [vmem:[%s2770_s0 + $0x48] sm:$0xff]  }
 0x166   :  { %v2399_v22 = vpop.eup %1613  ;;  %1625 = vpow2.f32 %v390_v15  ;;  %997 = vadd.xlane.f32.xlu1 %v2396_v56  ;;  %1522 = vmatprep.subr.bf16.mxu1 %v1577_v54 }
 0x167   :  { %v967_v61 = vmul.f32 1.442695, %v941_v20  ;;  %991 = vadd.xlane.f32.xlu0 %v2399_v22 }
 0x168   :  { %v341_v52 = vpop.xlane.xlu0 %340  ;;  %1523 = vmatpush3.bf16.msra.mxu1 %v1577_v54 }
 0x169   :  { %1627 = vpow2.f32 %v967_v61  ;;  %v360_v5 = vsub.f32 %v2250_v63, %v341_v52  ;;  %1524 = vmatprep.subr.bf16.mxu1 %v1578_v29 }
 0x16a   :  { %v2410_v3 = vpop.eup %1615 }
 0x16b   :  { %v2412_v43 = vpop.eup %1617  ;;  %v388_v6 = vmul.f32 1.442695, %v360_v5  ;;  %412 = vadd.xlane.f32.xlu0 %v2410_v3  ;;  %v926_v18 = vpop.xlane.xlu1 %925 }
 0x16c   :  { %418 = vadd.xlane.f32.xlu1 %v2412_v43  ;;  %v944_v19 = vsub.f32 %v2256_v31, %v926_v18  ;;  %v924_v14 = vpop.xlane.xlu0 %923  ;;  %1525 = vmatpush3.bf16.msra.mxu1 %v1578_v29 }
 0x16d   :  { %1629 = vpow2.f32 %v388_v6  ;;  %v943_v63 = vsub.f32 %v2261_v34, %v924_v14 }
 0x16e   :  { %v2421_v62 = vpop.eup %1619  ;;  %v973_v37 = vmul.f32 1.442695, %v944_v19 }
 0x16f   :  { %v2423_v13 = vpop.eup %1621  ;;  %v971_v17 = vmul.f32 1.442695, %v943_v63  ;;  %995 = vadd.xlane.f32.xlu0 %v2421_v62 }
 0x170   :  { %1631 = vpow2.f32 %v973_v37  ;;  %v345_v31 = vpop.xlane.xlu0 %344  ;;  %1001 = vadd.xlane.f32.xlu1 %v2423_v13  ;;  %v347_v30 = vpop.xlane.xlu1 %346 }
 0x171   :  { %1633 = vpow2.f32 %v971_v17  ;;  %v362_v34 = vsub.f32 %v2267_v26, %v345_v31  ;;  %v363_v12 = vsub.f32 %v2271_v21, %v347_v30 }
 0x172   :  { %v2429_v28 = vpop.eup %1623 }
 0x173   :  { %v2431_v45 = vpop.eup %1625  ;;  %v392_v8 = vmul.f32 1.442695, %v362_v34  ;;  %v394_v23 = vmul.f32 1.442695, %v363_v12  ;;  %416 = vadd.xlane.f32.xlu0 %v2429_v28 }
 0x174   :  { %v928_v40 = vpop.xlane.xlu0 %927  ;;  %422 = vadd.xlane.f32.xlu1 %v2431_v45 }
 0x175   :  { %1635 = vpow2.f32 %v392_v8  ;;  %v945_v1 = vsub.f32 %v2277_v33, %v928_v40  ;;  %v930_v42 = vpop.xlane.xlu1 %929 }
 0x176   :  { %v2436_v48 = vpop.eup %1627  ;;  %1637 = vpow2.f32 %v394_v23  ;;  %v946_v26 = vsub.f32 %v2282_v35, %v930_v42 }
 0x177   :  { %v975_v21 = vmul.f32 1.442695, %v945_v1  ;;  %999 = vadd.xlane.f32.xlu0 %v2436_v48 }
 0x178   :  { %v977_v47 = vmul.f32 1.442695, %v946_v26 }
 0x179   :  { %1639 = vpow2.f32 %v975_v21 }
 0x17a   :  { %v2440_v51 = vpop.eup %1629  ;;  %1641 = vpow2.f32 %v977_v47 }
 0x17b   :  { %420 = vadd.xlane.f32.xlu0 %v2440_v51 }
 0x17d   :  { %v2443_v60 = vpop.eup %1631 }
 0x17e   :  { %v2445_v58 = vpop.eup %1633  ;;  %1005 = vadd.xlane.f32.xlu1 %v2443_v60 }
 0x17f   :  { %1003 = vadd.xlane.f32.xlu0 %v2445_v58 }
 0x182   :  { %v2449_v33 = vpop.eup %1635 }
 0x183   :  { %v2451_v35 = vpop.eup %1637  ;;  %424 = vadd.xlane.f32.xlu0 %v2449_v33 }
 0x184   :  { %426 = vadd.xlane.f32.xlu1 %v2451_v35 }
 0x186   :  { %v2455_v27 = vpop.eup %1639 }
 0x187   :  { %v2457_v53 = vpop.eup %1641  ;;  %1007 = vadd.xlane.f32.xlu0 %v2455_v27 }
 0x188   :  { %1009 = vadd.xlane.f32.xlu1 %v2457_v53 }
 0x1bb   :  { %v397_v32 = vpop.xlane.xlu0 %396 }
 0x1bc   :  { %1643 = vrcp.f32 %v397_v32 }
 0x1bf   :  { %v399_v39 = vpop.xlane.xlu1 %398 }
 0x1c0   :  { %1645 = vrcp.f32 %v399_v39 }
 0x1c3   :  { %v980_v55 = vpop.xlane.xlu0 %979  ;;  %v982_v7 = vpop.xlane.xlu1 %981 }
 0x1c4   :  { %1647 = vrcp.f32 %v980_v55 }
 0x1c5   :  { %1649 = vrcp.f32 %v982_v7 }
 0x1c7   :  { %v401_v15 = vpop.xlane.xlu0 %400  ;;  %v403_v25 = vpop.xlane.xlu1 %402 }
 0x1c8   :  { %1651 = vrcp.f32 %v401_v15 }
 0x1c9   :  { %1653 = vrcp.f32 %v403_v25  ;;  %v1644_v20 = vpop.eup %1643 }
 0x1ca   :  { %v444_v61 = vmul.f32 %v1644_v20, %v2295_v9 }
 0x1cb   :  { %v986_v5 = vpop.xlane.xlu1 %985 }
 0x1cc   :  { %1655 = vrcp.f32 %v986_v5 }
 0x1cd   :  { %v1646_v38 = vpop.eup %1645 }
 0x1ce   :  { %v445_v52 = vmul.f32 %v1646_v38, %v2299_v10 }
 0x1cf   :  { %v407_v29 = vpop.xlane.xlu1 %406 }
 0x1d0   :  { %v460_v54 = vpack.c.bf16 %v445_v52, %v444_v61 }
 0x1d1   :  { %v1648_v6 = vpop.eup %1647 }
 0x1d2   :  { %v1650_v18 = vpop.eup %1649  ;;  %1494 = vmatprep.mubr.bf16.mxu0 %v460_v54  ;;  %v1027_v19 = vmul.f32 %v1648_v6, %v2304_v49 }
 0x1d3   :  { %v1028_v14 = vmul.f32 %v1650_v18, %v2302_v44 }
 0x1d5   :  { %v1652_v63 = vpop.eup %1651  ;;  %v1043_v37 = vpack.c.bf16 %v1028_v14, %v1027_v19 }
 0x1d6   :  { %v1654_v17 = vpop.eup %1653  ;;  %v446_v31 = vmul.f32 %v1652_v63, %v2314_v50 }
 0x1d7   :  { %1526 = vmatprep.mubr.bf16.mxu1 %v1043_v37  ;;  %v447_v9 = vmul.f32 %v1654_v17, %v2308_v16  ;;  %v990_v30 = vpop.xlane.xlu1 %989 }
 0x1d9   :  { %v461_v10 = vpack.c.bf16 %v447_v9, %v446_v31  ;;  %v1656_v50 = vpop.eup %1655 }
 0x1da   :  { %v1030_v26 = vmul.f32 %v1656_v50, %v2321_v24 }
 0x1db   :  { %1495 = vmatmul.mubr.bf16.vlgmr.msra.gmra.mxu0 %v461_v10 }
 0x1dc   :  { %v411_v34 = vpop.xlane.xlu1 %410 }
 0x1e0   :  { %v984_v12 = vpop.xlane.xlu0 %983 }
 0x1e1   :  { %1657 = vrcp.f32 %v984_v12  ;;  %v994_v8 = vpop.xlane.xlu1 %993 }
 0x1e2   :  { %1659 = vrcp.f32 %v407_v29 }
 0x1e4   :  { %v405_v49 = vpop.xlane.xlu0 %404 }
 0x1e5   :  { %1661 = vrcp.f32 %v405_v49  ;;  %v415_v23 = vpop.xlane.xlu1 %414 }
 0x1e6   :  { %1663 = vrcp.f32 %v990_v30 }
 0x1e8   :  { %v988_v44 = vpop.xlane.xlu0 %987 }
 0x1e9   :  { %1665 = vrcp.f32 %v988_v44 }
 0x1ea   :  { %1667 = vrcp.f32 %v411_v34 }
 0x1ec   :  { %v409_v40 = vpop.xlane.xlu0 %408 }
 0x1ed   :  { %1669 = vrcp.f32 %v409_v40 }
 0x1ee   :  { %v1658_v16 = vpop.eup %1657  ;;  %1671 = vrcp.f32 %v994_v8 }
 0x1ef   :  { %v998_v1 = vpop.xlane.xlu1 %997  ;;  %v1029_v42 = vmul.f32 %v1658_v16, %v2360_v0  ;;  %v1660_v21 = vpop.eup %1659 }
 0x1f0   :  { %v992_v47 = vpop.xlane.xlu0 %991  ;;  %v449_v7 = vmul.f32 %v1660_v21, %v2325_v2 }
 0x1f1   :  { %1673 = vrcp.f32 %v992_v47  ;;  %v1044_v32 = vpack.c.bf16 %v1030_v26, %v1029_v42 }
 0x1f2   :  { %v1662_v39 = vpop.eup %1661  ;;  %1675 = vrcp.f32 %v415_v23 }
 0x1f3   :  { %1527 = vmatmul.mubr.bf16.vlgmr.msra.gmra.mxu1 %v1044_v32  ;;  %v448_v55 = vmul.f32 %v1662_v39, %v2371_v36  ;;  %v1664_v15 = vpop.eup %1663 }
 0x1f4   :  { %v413_v25 = vpop.xlane.xlu0 %412  ;;  %v1032_v0 = vmul.f32 %v1664_v15, %v2341_v57 }
 0x1f5   :  { %1677 = vrcp.f32 %v413_v25  ;;  %v419_v20 = vpop.xlane.xlu1 %418  ;;  %v462_v38 = vpack.c.bf16 %v449_v7, %v448_v55 }
 0x1f6   :  { %v1666_v61 = vpop.eup %1665  ;;  %1679 = vrcp.f32 %v998_v1 }
 0x1f7   :  { %1498 = vmatprep.mubr.bf16.mxu0 %v462_v38  ;;  %v1031_v24 = vmul.f32 %v1666_v61, %v2384_v41  ;;  %v1668_v52 = vpop.eup %1667 }
 0x1f8   :  { %v996_v5 = vpop.xlane.xlu0 %995  ;;  %v451_v18 = vmul.f32 %v1668_v52, %v2349_v4 }
 0x1f9   :  { %1681 = vrcp.f32 %v996_v5  ;;  %v1045_v54 = vpack.c.bf16 %v1032_v0, %v1031_v24  ;;  %v1002_v36 = vpop.xlane.xlu1 %1001 }
 0x1fa   :  { %v1670_v6 = vpop.eup %1669  ;;  %1683 = vrcp.f32 %v419_v20 }
 0x1fb   :  { %1530 = vmatprep.mubr.bf16.mxu1 %v1045_v54  ;;  %v450_v2 = vmul.f32 %v1670_v6, %v2389_v11  ;;  %v1672_v19 = vpop.eup %1671 }
 0x1fc   :  { %v417_v14 = vpop.xlane.xlu0 %416  ;;  %v1034_v41 = vmul.f32 %v1672_v19, %v2365_v46 }
 0x1fd   :  { %1685 = vrcp.f32 %v417_v14  ;;  %v463_v63 = vpack.c.bf16 %v451_v18, %v450_v2  ;;  %v423_v17 = vpop.xlane.xlu1 %422 }
 0x1fe   :  { %v1674_v29 = vpop.eup %1673  ;;  %1687 = vrcp.f32 %v1002_v36 }
 0x1ff   :  { %1499 = vmatmul.mubr.bf16.gmra.mxu0 %v463_v63  ;;  %v1033_v57 = vmul.f32 %v1674_v29, %v2399_v22  ;;  %v1676_v37 = vpop.eup %1675 }
 0x200   :  { %v1000_v31 = vpop.xlane.xlu0 %999  ;;  %v453_v11 = vmul.f32 %v1676_v37, %v2376_v59 }
 0x201   :  { %1689 = vrcp.f32 %v1000_v31  ;;  %v1046_v9 = vpack.c.bf16 %v1034_v41, %v1033_v57 }
 0x202   :  { %v1678_v30 = vpop.eup %1677  ;;  %1691 = vrcp.f32 %v423_v17 }
 0x203   :  { %1531 = vmatmul.mubr.bf16.gmra.mxu1 %v1046_v9  ;;  %v452_v4 = vmul.f32 %v1678_v30, %v2410_v3  ;;  %v1680_v10 = vpop.eup %1679 }
 0x204   :  { %v421_v34 = vpop.xlane.xlu0 %420  ;;  %v1036_v8 = vmul.f32 %v1680_v10, %v2396_v56 }
 0x205   :  { %1693 = vrcp.f32 %v421_v34  ;;  %v464_v12 = vpack.c.bf16 %v453_v11, %v452_v4  ;;  %v2509_v4 = vld [vmem:[%s2775_s5 + $0x1] ss:$0 sm:$0xff] }
 0x206   :  { %v1682_v49 = vpop.eup %1681 }
 0x207   :  { %1502 = vmatprep.mubr.bf16.mxu0 %v464_v12  ;;  %v1006_v22 = vpop.xlane.xlu1 %1005  ;;  %v1035_v46 = vmul.f32 %v1682_v49, %v2421_v62  ;;  %v1684_v44 = vpop.eup %1683 }
 0x208   :  { %1695 = vrcp.f32 %v1006_v22  ;;  %v1004_v23 = vpop.xlane.xlu0 %1003  ;;  %v455_v3 = vmul.f32 %v1684_v44, %v2412_v43 }
 0x209   :  { %1697 = vrcp.f32 %v1004_v23  ;;  %v1047_v50 = vpack.c.bf16 %v1036_v8, %v1035_v46 }
 0x20a   :  { %v1686_v40 = vpop.eup %1685 }
 0x20b   :  { %1534 = vmatprep.mubr.bf16.mxu1 %v1047_v50  ;;  %v454_v59 = vmul.f32 %v1686_v40, %v2429_v28  ;;  %v1688_v16 = vpop.eup %1687 }
 0x20c   :  { %v425_v1 = vpop.xlane.xlu0 %424  ;;  %v1038_v62 = vmul.f32 %v1688_v16, %v2423_v13 }
 0x20d   :  { %1699 = vrcp.f32 %v425_v1  ;;  %v427_v42 = vpop.xlane.xlu1 %426  ;;  %v465_v26 = vpack.c.bf16 %v455_v3, %v454_v59 }
 0x20e   :  { %v1690_v21 = vpop.eup %1689  ;;  %1701 = vrcp.f32 %v427_v42 }
 0x20f   :  { %1503 = vmatmul.mubr.bf16.gmra.mxu0 %v465_v26  ;;  %v1037_v56 = vmul.f32 %v1690_v21, %v2436_v48  ;;  %v1692_v47 = vpop.eup %1691 }
 0x210   :  { %v1008_v32 = vpop.xlane.xlu0 %1007  ;;  %v457_v7 = vmul.f32 %v1692_v47, %v2431_v45 }
 0x211   :  { %1703 = vrcp.f32 %v1008_v32  ;;  %v1010_v39 = vpop.xlane.xlu1 %1009  ;;  %v1048_v55 = vpack.c.bf16 %v1038_v62, %v1037_v56 }
 0x212   :  { %v1694_v28 = vpop.eup %1693  ;;  %1705 = vrcp.f32 %v1010_v39 }
 0x213   :  { %1535 = vmatmul.mubr.bf16.gmra.mxu1 %v1048_v55  ;;  %v456_v43 = vmul.f32 %v1694_v28, %v2440_v51 }
 0x215   :  { %v1696_v15 = vpop.eup %1695  ;;  %v466_v25 = vpack.c.bf16 %v457_v7, %v456_v43 }
 0x216   :  { %v1698_v20 = vpop.eup %1697  ;;  %v1040_v38 = vmul.f32 %v1696_v15, %v2443_v60 }
 0x217   :  { %1506 = vmatprep.mubr.bf16.mxu0 %v466_v25  ;;  %v1039_v13 = vmul.f32 %v1698_v20, %v2445_v58  ;;  %v2496_v58 = vld [vmem:[%s2775_s5] ss:$0 sm:$0xff] }
 0x219   :  { %v1049_v48 = vpack.c.bf16 %v1040_v38, %v1039_v13 }
 0x21a   :  { %v1700_v61 = vpop.eup %1699 }
 0x21b   :  { %v1702_v24 = vpop.eup %1701  ;;  %1538 = vmatprep.mubr.bf16.mxu1 %v1049_v48  ;;  %v458_v0 = vmul.f32 %v1700_v61, %v2449_v33 }
 0x21c   :  { %v459_v52 = vmul.f32 %v1702_v24, %v2451_v35 }
 0x21e   :  { %v1704_v5 = vpop.eup %1703  ;;  %v467_v51 = vpack.c.bf16 %v459_v52, %v458_v0 }
 0x21f   :  { %v1706_v54 = vpop.eup %1705  ;;  %v1041_v45 = vmul.f32 %v1704_v5, %v2455_v27 }
 0x220   :  { %1507 = vmatmul.mubr.bf16.gmra.mxu0 %v467_v51  ;;  %v1042_v6 = vmul.f32 %v1706_v54, %v2457_v53 }
 0x222   :  { %v1050_v60 = vpack.c.bf16 %v1042_v6, %v1041_v45 }
 0x224   :  { %1539 = vmatmul.mubr.bf16.gmra.mxu1 %v1050_v60 }
 0x29b   :  { %v1496_v36 = vpop.f32.mrf.mxu0 }
 0x29c   :  { %v582_v33 = vadd.f32 %v1496_v36, %v2496_v58 }
 0x29d   :  { %v573_v2 = vpop.f32.mrf.mxu0 }
 0x29e   :  { %v656_v35 = vmul.f32 1.442695, %v582_v33  ;;  %v574_v18 = vadd.f32 %v2496_v58, %v573_v2  ;;  %vm638_vm3 = vcmp.gt.f32.partialorder %v582_v33, 0.0 }
 0x29f   :  { %v1497_v19 = vpop.f32.mrf.mxu0 }
 0x2a0   :  { %1707 = vpow2.f32 %v656_v35  ;;  %v652_v27 = vmul.f32 1.442695, %v574_v18  ;;  %v585_v14 = vadd.f32 %v1497_v19, %v2496_v58  ;;  %vm636_vm4 = vcmp.gt.f32.partialorder %v574_v18, 0.0 }
 0x2a1   :  { %v576_v53 = vpop.f32.mrf.mxu0 }
 0x2a2   :  { %1709 = vpow2.f32 %v652_v27  ;;  %v658_v63 = vmul.f32 1.442695, %v585_v14  ;;  %v577_v29 = vadd.f32 %v2496_v58, %v576_v53  ;;  %vm639_vm5 = vcmp.gt.f32.partialorder %v585_v14, 0.0 }
 0x2a4   :  { %1711 = vpow2.f32 %v658_v63  ;;  %v654_v57 = vmul.f32 1.442695, %v577_v29  ;;  %vm637_vm6 = vcmp.gt.f32.partialorder %v577_v29, 0.0 }
 0x2a6   :  { %1713 = vpow2.f32 %v654_v57 }
 0x2ad   :  { %v1708_v41 = vpop.eup %1707 }
 0x2ae   :  { %v1334_v37 = vadd.f32 -1.0, %v1708_v41 }
 0x2af   :  { %v1710_v17 = vpop.eup %1709 }
 0x2b0   :  { %v702_v31 = vsel %vm638_vm3, %v582_v33, %v1334_v37  ;;  %v1332_v9 = vadd.f32 -1.0, %v1710_v17 }
 0x2b1   :  { %v1712_v30 = vpop.eup %1711  ;;  %719 = vst.msk [vmem:[%s2776_s6 + $0x10] sm:$0xff] %vm716_vm1, %v702_v31 }
 0x2b2   :  { %v700_v11 = vsel %vm636_vm4, %v574_v18, %v1332_v9  ;;  %v1335_v10 = vadd.f32 -1.0, %v1712_v30 }
 0x2b3   :  { %v1714_v34 = vpop.eup %1713  ;;  %717 = vst.msk [vmem:[%s2776_s6] sm:$0xff] %vm716_vm1, %v700_v11  ;;  %v1528_v12 = vpop.f32.mrf.mxu1 }
 0x2b4   :  { %v703_v49 = vsel %vm639_vm5, %v585_v14, %v1335_v10  ;;  %v1333_v22 = vadd.f32 -1.0, %v1714_v34  ;;  %v1167_v46 = vadd.f32 %v1528_v12, %v2509_v4 }
 0x2b5   :  { %720 = vst.msk [vmem:[%s2776_s6 + $0x18] sm:$0xff] %vm716_vm1, %v703_v49  ;;  %v1158_v8 = vpop.f32.mrf.mxu1 }
 0x2b6   :  { %v701_v44 = vsel %vm637_vm6, %v577_v29, %v1333_v22  ;;  %v1241_v23 = vmul.f32 1.442695, %v1167_v46  ;;  %v1159_v50 = vadd.f32 %v2509_v4, %v1158_v8  ;;  %vm1223_vm8 = vcmp.gt.f32.partialorder %v1167_v46, 0.0 }
 0x2b7   :  { %718 = vst.msk [vmem:[%s2776_s6 + $0x8] sm:$0xff] %vm716_vm1, %v701_v44  ;;  %v1529_v40 = vpop.f32.mrf.mxu1 }
 0x2b8   :  { %1715 = vpow2.f32 %v1241_v23  ;;  %v1237_v59 = vmul.f32 1.442695, %v1159_v50  ;;  %v1170_v3 = vadd.f32 %v1529_v40, %v2509_v4  ;;  %vm1221_vm9 = vcmp.gt.f32.partialorder %v1159_v50, 0.0 }
 0x2b9   :  { %v1161_v16 = vpop.f32.mrf.mxu1 }
 0x2ba   :  { %1717 = vpow2.f32 %v1237_v59  ;;  %v1243_v1 = vmul.f32 1.442695, %v1170_v3  ;;  %v1162_v42 = vadd.f32 %v2509_v4, %v1161_v16  ;;  %vm1224_vm7 = vcmp.gt.f32.partialorder %v1170_v3, 0.0 }
 0x2bc   :  { %1719 = vpow2.f32 %v1243_v1  ;;  %v1239_v26 = vmul.f32 1.442695, %v1162_v42  ;;  %vm1222_vm10 = vcmp.gt.f32.partialorder %v1162_v42, 0.0 }
 0x2be   :  { %1721 = vpow2.f32 %v1239_v26 }
 0x2bf   :  { %v1500_v21 = vpop.f32.mrf.mxu0 }
 0x2c0   :  { %v2528_v56 = vadd.f32 %v1500_v21, %v2496_v58 }
 0x2c1   :  { %v589_v62 = vpop.f32.mrf.mxu0 }
 0x2c2   :  { %v664_v47 = vmul.f32 1.442695, %v2528_v56  ;;  %v2532_v32 = vadd.f32 %v2496_v58, %v589_v62  ;;  %vm642_vm11 = vcmp.gt.f32.partialorder %v2528_v56, 0.0 }
 0x2c3   :  { %v1501_v39 = vpop.f32.mrf.mxu0  ;;  %v1532_v55 = vpop.f32.mrf.mxu1 }
 0x2c4   :  { %1723 = vpow2.f32 %v664_v47  ;;  %v660_v28 = vmul.f32 1.442695, %v2532_v32  ;;  %v2536_v43 = vadd.f32 %v1501_v39, %v2496_v58  ;;  %v2539_v15 = vadd.f32 %v1532_v55, %v2509_v4 }
 0x2c5   :  { %v1716_v7 = vpop.eup %1715  ;;  %v592_v25 = vpop.f32.mrf.mxu0  ;;  %vm640_vm12 = vcmp.gt.f32.partialorder %v2532_v32, 0.0 }
 0x2c6   :  { %v1174_v20 = vpop.f32.mrf.mxu1  ;;  %v1377_v38 = vadd.f32 -1.0, %v1716_v7  ;;  %1725 = vpow2.f32 %v660_v28  ;;  %v666_v13 = vmul.f32 1.442695, %v2536_v43  ;;  %v1249_v61 = vmul.f32 1.442695, %v2539_v15 }
 0x2c7   :  { %v1718_v48 = vpop.eup %1717  ;;  %v2544_v24 = vadd.f32 %v2496_v58, %v592_v25  ;;  %v2547_v0 = vadd.f32 %v2509_v4, %v1174_v20  ;;  %vm643_vm13 = vcmp.gt.f32.partialorder %v2536_v43, 0.0  ;;  %vm1227_vm14 = vcmp.gt.f32.partialorder %v2539_v15, 0.0 }
 0x2c8   :  { %v1533_v52 = vpop.f32.mrf.mxu1  ;;  %v1287_v5 = vsel %vm1223_vm8, %v1167_v46, %v1377_v38  ;;  %v1375_v51 = vadd.f32 -1.0, %v1718_v48  ;;  %1727 = vpow2.f32 %v666_v13 }
 0x2c9   :  { %v2550_v54 = vadd.f32 %v1533_v52, %v2509_v4  ;;  %v1720_v45 = vpop.eup %1719  ;;  %1393 = vst.msk [vmem:[%s2776_s6 + $0x90] sm:$0xff] %vm716_vm1, %v1287_v5  ;;  %1729 = vpow2.f32 %v1249_v61  ;;  %v662_v6 = vmul.f32 1.442695, %v2544_v24  ;;  %v1245_v2 = vmul.f32 1.442695, %v2547_v0 }
 0x2ca   :  { %v1177_v60 = vpop.f32.mrf.mxu1  ;;  %v1285_v36 = vsel %vm1221_vm9, %v1159_v50, %v1375_v51  ;;  %v1378_v33 = vadd.f32 -1.0, %v1720_v45  ;;  %vm641_vm15 = vcmp.gt.f32.partialorder %v2544_v24, 0.0  ;;  %vm1225_vm0 = vcmp.gt.f32.partialorder %v2547_v0, 0.0 }
 0x2cb   :  { %v1722_v35 = vpop.eup %1721  ;;  %1391 = vst.msk [vmem:[%s2776_s6 + $0x80] sm:$0xff] %vm716_vm1, %v1285_v36  ;;  %1731 = vpow2.f32 %v662_v6  ;;  %v1251_v18 = vmul.f32 1.442695, %v2550_v54  ;;  %v2564_v19 = vadd.f32 %v2509_v4, %v1177_v60  ;;  %vm1228_vm2 = vcmp.gt.f32.partialorder %v2550_v54, 0.0 }
 0x2cc   :  { %v1288_v27 = vsel %vm1224_vm7, %v1170_v3, %v1378_v33  ;;  %v1376_v14 = vadd.f32 -1.0, %v1722_v35  ;;  %1733 = vpow2.f32 %v1245_v2 }
 0x2cd   :  { %1394 = vst.msk [vmem:[%s2776_s6 + $0x98] sm:$0xff] %vm716_vm1, %v1288_v27  ;;  %1735 = vpow2.f32 %v1251_v18  ;;  %v1247_v53 = vmul.f32 1.442695, %v2564_v19  ;;  %vm1226_vm3 = vcmp.gt.f32.partialorder %v2564_v19, 0.0 }
 0x2ce   :  { %v1286_v63 = vsel %vm1222_vm10, %v1162_v42, %v1376_v14 }
 0x2cf   :  { %1392 = vst.msk [vmem:[%s2776_s6 + $0x88] sm:$0xff] %vm716_vm1, %v1286_v63  ;;  %1737 = vpow2.f32 %v1247_v53  ;;  %v1504_v29 = vpop.f32.mrf.mxu0 }
 0x2d0   :  { %v2576_v57 = vadd.f32 %v1504_v29, %v2496_v58 }
 0x2d1   :  { %v1724_v41 = vpop.eup %1723  ;;  %v605_v37 = vpop.f32.mrf.mxu0 }
 0x2d2   :  { %v1338_v17 = vadd.f32 -1.0, %v1724_v41  ;;  %v672_v31 = vmul.f32 1.442695, %v2576_v57  ;;  %v2580_v9 = vadd.f32 %v2496_v58, %v605_v37  ;;  %vm646_vm4 = vcmp.gt.f32.partialorder %v2576_v57, 0.0 }
 0x2d3   :  { %v1726_v30 = vpop.eup %1725  ;;  %v1505_v11 = vpop.f32.mrf.mxu0 }
 0x2d4   :  { %v1536_v10 = vpop.f32.mrf.mxu1  ;;  %v706_v34 = vsel %vm642_vm11, %v2528_v56, %v1338_v17  ;;  %v1336_v12 = vadd.f32 -1.0, %v1726_v30  ;;  %1739 = vpow2.f32 %v672_v31  ;;  %v668_v22 = vmul.f32 1.442695, %v2580_v9 }
 0x2d5   :  { %v1728_v49 = vpop.eup %1727  ;;  %723 = vst.msk [vmem:[%s2776_s6 + $0x30] sm:$0xff] %vm716_vm1, %v706_v34  ;;  %v2591_v46 = vadd.f32 %v1505_v11, %v2496_v58  ;;  %v2594_v8 = vadd.f32 %v1536_v10, %v2509_v4  ;;  %v608_v44 = vpop.f32.mrf.mxu0  ;;  %vm644_vm5 = vcmp.gt.f32.partialorder %v2580_v9, 0.0 }
 0x2d6   :  { %v1190_v23 = vpop.f32.mrf.mxu1  ;;  %v1730_v50 = vpop.eup %1729  ;;  %v704_v40 = vsel %vm640_vm12, %v2532_v32, %v1336_v12  ;;  %v1339_v59 = vadd.f32 -1.0, %v1728_v49  ;;  %v2598_v3 = vadd.f32 %v2496_v58, %v608_v44  ;;  %1741 = vpow2.f32 %v668_v22 }
 0x2d7   :  { %v2601_v16 = vadd.f32 %v2509_v4, %v1190_v23  ;;  %721 = vst.msk [vmem:[%s2776_s6 + $0x20] sm:$0xff] %vm716_vm1, %v704_v40  ;;  %v1381_v1 = vadd.f32 -1.0, %v1730_v50  ;;  %v674_v42 = vmul.f32 1.442695, %v2591_v46  ;;  %v1257_v62 = vmul.f32 1.442695, %v2594_v8 }
 0x2d8   :  { %v1537_v26 = vpop.f32.mrf.mxu1  ;;  %v1732_v21 = vpop.eup %1731  ;;  %v707_v56 = vsel %vm643_vm13, %v2536_v43, %v1339_v59  ;;  %v670_v55 = vmul.f32 1.442695, %v2598_v3  ;;  %vm647_vm6 = vcmp.gt.f32.partialorder %v2591_v46, 0.0  ;;  %vm1231_vm8 = vcmp.gt.f32.partialorder %v2594_v8, 0.0 }
 0x2d9   :  { %v1734_v47 = vpop.eup %1733  ;;  %724 = vst.msk [vmem:[%s2776_s6 + $0x38] sm:$0xff] %vm716_vm1, %v707_v56  ;;  %v1291_v32 = vsel %vm1227_vm14, %v2539_v15, %v1381_v1  ;;  %v1337_v39 = vadd.f32 -1.0, %v1732_v21  ;;  %1743 = vpow2.f32 %v674_v42  ;;  %v1253_v25 = vmul.f32 1.442695, %v2601_v16 }
 0x2da   :  { %v1193_v28 = vpop.f32.mrf.mxu1  ;;  %v1736_v43 = vpop.eup %1735  ;;  %1397 = vst.msk [vmem:[%s2776_s6 + $0xb0] sm:$0xff] %vm716_vm1, %v1291_v32  ;;  %v1379_v7 = vadd.f32 -1.0, %v1734_v47  ;;  %1745 = vpow2.f32 %v1257_v62  ;;  %v2627_v38 = vadd.f32 %v1537_v26, %v2509_v4  ;;  %vm645_vm9 = vcmp.gt.f32.partialorder %v2598_v3, 0.0 }
 0x2db   :  { %v705_v20 = vsel %vm641_vm15, %v2544_v24, %v1337_v39  ;;  %v1382_v15 = vadd.f32 -1.0, %v1736_v43  ;;  %1747 = vpow2.f32 %v670_v55  ;;  %v2636_v61 = vadd.f32 %v2509_v4, %v1193_v28 }
 0x2dc   :  { %v1738_v13 = vpop.eup %1737  ;;  %722 = vst.msk [vmem:[%s2776_s6 + $0x28] sm:$0xff] %vm716_vm1, %v705_v20  ;;  %v1289_v48 = vsel %vm1225_vm0, %v2547_v0, %v1379_v7  ;;  %1749 = vpow2.f32 %v1253_v25  ;;  %v1259_v5 = vmul.f32 1.442695, %v2627_v38  ;;  %vm1229_vm7 = vcmp.gt.f32.partialorder %v2601_v16, 0.0 }
 0x2dd   :  { %1395 = vst.msk [vmem:[%s2776_s6 + $0xa0] sm:$0xff] %vm716_vm1, %v1289_v48  ;;  %v1292_v24 = vsel %vm1228_vm2, %v2550_v54, %v1382_v15  ;;  %v1380_v52 = vadd.f32 -1.0, %v1738_v13  ;;  %v1255_v0 = vmul.f32 1.442695, %v2636_v61  ;;  %vm1232_vm10 = vcmp.gt.f32.partialorder %v2627_v38, 0.0 }
 0x2de   :  { %1398 = vst.msk [vmem:[%s2776_s6 + $0xb8] sm:$0xff] %vm716_vm1, %v1292_v24  ;;  %1751 = vpow2.f32 %v1259_v5  ;;  %vm1230_vm11 = vcmp.gt.f32.partialorder %v2636_v61, 0.0 }
 0x2df   :  { %v1290_v51 = vsel %vm1226_vm3, %v2564_v19, %v1380_v52  ;;  %1753 = vpow2.f32 %v1255_v0 }
 0x2e0   :  { %1396 = vst.msk [vmem:[%s2776_s6 + $0xa8] sm:$0xff] %vm716_vm1, %v1290_v51  ;;  %v1508_v54 = vpop.f32.mrf.mxu0 }
 0x2e1   :  { %v1740_v45 = vpop.eup %1739  ;;  %v2656_v6 = vadd.f32 %v1508_v54, %v2496_v58 }
 0x2e2   :  { %v1342_v60 = vadd.f32 -1.0, %v1740_v45  ;;  %v621_v36 = vpop.f32.mrf.mxu0 }
 0x2e3   :  { %v680_v33 = vmul.f32 1.442695, %v2656_v6  ;;  %v2661_v2 = vadd.f32 %v2496_v58, %v621_v36  ;;  %v1742_v35 = vpop.eup %1741  ;;  %vm650_vm12 = vcmp.gt.f32.partialorder %v2656_v6, 0.0 }
 0x2e4   :  { %v710_v18 = vsel %vm646_vm4, %v2576_v57, %v1342_v60  ;;  %v1509_v19 = vpop.f32.mrf.mxu0  ;;  %v1540_v27 = vpop.f32.mrf.mxu1  ;;  %v1340_v14 = vadd.f32 -1.0, %v1742_v35 }
 0x2e5   :  { %727 = vst.msk [vmem:[%s2776_s6 + $0x50] sm:$0xff] %vm716_vm1, %v710_v18  ;;  %1755 = vpow2.f32 %v680_v33  ;;  %v676_v53 = vmul.f32 1.442695, %v2661_v2  ;;  %v2672_v29 = vadd.f32 %v1509_v19, %v2496_v58  ;;  %v2675_v57 = vadd.f32 %v1540_v27, %v2509_v4 }
 0x2e6   :  { %v1744_v63 = vpop.eup %1743  ;;  %v624_v41 = vpop.f32.mrf.mxu0  ;;  %v708_v31 = vsel %vm644_vm5, %v2580_v9, %v1340_v14  ;;  %vm648_vm13 = vcmp.gt.f32.partialorder %v2661_v2, 0.0 }
 0x2e7   :  { %v1206_v37 = vpop.f32.mrf.mxu1  ;;  %v1746_v17 = vpop.eup %1745  ;;  %v1343_v30 = vadd.f32 -1.0, %v1744_v63  ;;  %1757 = vpow2.f32 %v676_v53  ;;  %v2679_v11 = vadd.f32 %v2496_v58, %v624_v41  ;;  %725 = vst.msk [vmem:[%s2776_s6 + $0x40] sm:$0xff] %vm716_vm1, %v708_v31  ;;  %v682_v12 = vmul.f32 1.442695, %v2672_v29 }
 0x2e8   :  { %v1748_v10 = vpop.eup %1747  ;;  %v1385_v34 = vadd.f32 -1.0, %v1746_v17  ;;  %v1265_v44 = vmul.f32 1.442695, %v2675_v57  ;;  %v1207_v1 = vadd.f32 %v2509_v4, %v1206_v37  ;;  %vm651_vm14 = vcmp.gt.f32.partialorder %v2672_v29, 0.0 }
 0x2e9   :  { %v1541_v49 = vpop.f32.mrf.mxu1  ;;  %v1750_v9 = vpop.eup %1749  ;;  %v711_v58 = vsel %vm647_vm6, %v2591_v46, %v1343_v30  ;;  %v1341_v22 = vadd.f32 -1.0, %v1748_v10  ;;  %1759 = vpow2.f32 %v682_v12  ;;  %v678_v40 = vmul.f32 1.442695, %v2679_v11 }
 0x2ea   :  { %728 = vst.msk [vmem:[%s2776_s6 + $0x58] sm:$0xff] %vm716_vm1, %v711_v58  ;;  %v1295_v23 = vsel %vm1231_vm8, %v2594_v8, %v1385_v34  ;;  %v1383_v50 = vadd.f32 -1.0, %v1750_v9  ;;  %1761 = vpow2.f32 %v1265_v44  ;;  %v1218_v42 = vadd.f32 %v1541_v49, %v2509_v4 }
 0x2eb   :  { %v1209_v59 = vpop.f32.mrf.mxu1  ;;  %1401 = vst.msk [vmem:[%s2776_s6 + $0xd0] sm:$0xff] %vm716_vm1, %v1295_v23  ;;  %v709_v46 = vsel %vm645_vm9, %v2598_v3, %v1341_v22  ;;  %v1752_v26 = vpop.eup %1751  ;;  %1763 = vpow2.f32 %v678_v40  ;;  %v1261_v62 = vmul.f32 1.442695, %v1207_v1  ;;  %vm1235_vm15 = vcmp.gt.f32.partialorder %v2675_v57, 0.0 }
 0x2ec   :  { %726 = vst.msk [vmem:[%s2776_s6 + $0x48] sm:$0xff] %vm716_vm1, %v709_v46  ;;  %v1293_v8 = vsel %vm1229_vm7, %v2601_v16, %v1383_v50  ;;  %v1210_v21 = vadd.f32 %v2509_v4, %v1209_v59  ;;  %v1754_v56 = vpop.eup %1753  ;;  %v1386_v3 = vadd.f32 -1.0, %v1752_v26  ;;  %v1267_v32 = vmul.f32 1.442695, %v1218_v42 }
 0x2ed   :  { %1399 = vst.msk [vmem:[%s2776_s6 + $0xc0] sm:$0xff] %vm716_vm1, %v1293_v8  ;;  %v1384_v47 = vadd.f32 -1.0, %v1754_v56  ;;  %1765 = vpow2.f32 %v1261_v62  ;;  %vm649_vm0 = vcmp.gt.f32.partialorder %v2679_v11, 0.0  ;;  %vm1233_vm2 = vcmp.gt.f32.partialorder %v1207_v1, 0.0 }
 0x2ee   :  { %v1263_v39 = vmul.f32 1.442695, %v1210_v21  ;;  %v1296_v55 = vsel %vm1232_vm10, %v2627_v38, %v1386_v3  ;;  %1767 = vpow2.f32 %v1267_v32  ;;  %vm1236_vm3 = vcmp.gt.f32.partialorder %v1218_v42, 0.0 }
 0x2ef   :  { %1402 = vst.msk [vmem:[%s2776_s6 + $0xd8] sm:$0xff] %vm716_vm1, %v1296_v55  ;;  %v1294_v4 = vsel %vm1230_vm11, %v2636_v61, %v1384_v47  ;;  %vm1234_vm4 = vcmp.gt.f32.partialorder %v1210_v21, 0.0 }
 0x2f0   :  { %1400 = vst.msk [vmem:[%s2776_s6 + $0xc8] sm:$0xff] %vm716_vm1, %v1294_v4  ;;  %1769 = vpow2.f32 %v1263_v39 }
 0x2f2   :  { %v1756_v16 = vpop.eup %1755 }
 0x2f3   :  { %v1346_v28 = vadd.f32 -1.0, %v1756_v16 }
 0x2f4   :  { %v1758_v43 = vpop.eup %1757 }
 0x2f5   :  { %v714_v7 = vsel %vm650_vm12, %v2656_v6, %v1346_v28  ;;  %v1344_v25 = vadd.f32 -1.0, %v1758_v43 }
 0x2f6   :  { %731 = vst.msk [vmem:[%s2776_s6 + $0x70] sm:$0xff] %vm716_vm1, %v714_v7  ;;  %v1760_v20 = vpop.eup %1759 }
 0x2f7   :  { %v712_v15 = vsel %vm648_vm13, %v2661_v2, %v1344_v25  ;;  %v1762_v38 = vpop.eup %1761  ;;  %v1347_v13 = vadd.f32 -1.0, %v1760_v20 }
 0x2f8   :  { %729 = vst.msk [vmem:[%s2776_s6 + $0x60] sm:$0xff] %vm716_vm1, %v712_v15  ;;  %v1764_v48 = vpop.eup %1763  ;;  %v1389_v61 = vadd.f32 -1.0, %v1762_v38 }
 0x2f9   :  { %v715_v24 = vsel %vm651_vm14, %v2672_v29, %v1347_v13  ;;  %v1345_v52 = vadd.f32 -1.0, %v1764_v48 }
 0x2fa   :  { %732 = vst.msk [vmem:[%s2776_s6 + $0x78] sm:$0xff] %vm716_vm1, %v715_v24  ;;  %v1299_v5 = vsel %vm1235_vm15, %v2675_v57, %v1389_v61  ;;  %v1766_v0 = vpop.eup %1765 }
 0x2fb   :  { %1405 = vst.msk [vmem:[%s2776_s6 + $0xf0] sm:$0xff] %vm716_vm1, %v1299_v5  ;;  %v713_v51 = vsel %vm649_vm0, %v2679_v11, %v1345_v52  ;;  %v1768_v54 = vpop.eup %1767  ;;  %v1387_v45 = vadd.f32 -1.0, %v1766_v0 }
 0x2fc   :  { %730 = vst.msk [vmem:[%s2776_s6 + $0x68] sm:$0xff] %vm716_vm1, %v713_v51  ;;  %v1390_v60 = vadd.f32 -1.0, %v1768_v54 }
 0x2fd   :  { %v1770_v6 = vpop.eup %1769  ;;  %v1297_v36 = vsel %vm1233_vm2, %v1207_v1, %v1387_v45 }
 0x2fe   :  { %v1388_v33 = vadd.f32 -1.0, %v1770_v6  ;;  %1403 = vst.msk [vmem:[%s2776_s6 + $0xe0] sm:$0xff] %vm716_vm1, %v1297_v36  ;;  %v1300_v2 = vsel %vm1236_vm3, %v1218_v42, %v1390_v60 }
 0x2ff   :  { %1406 = vst.msk [vmem:[%s2776_s6 + $0xf8] sm:$0xff] %vm716_vm1, %v1300_v2 }
 0x300   :  { %v1298_v35 = vsel %vm1234_vm4, %v1210_v21, %v1388_v33 }
 0x301   :  { %1404 = vst.msk [vmem:[%s2776_s6 + $0xe8] sm:$0xff] %vm716_vm1, %v1298_v35 }
 0x302   :  { %1322 = vsyncpa [#allocation3], 1 }

</bundles_post_ra>
